<compile_context>
chip_gen: v7x
topology: tpu7x:2x2x1
jax: 0.10.0
libtpu: 0.0.40
codegen_flags: <defaults>
</compile_context>

<pallas_src>
import jax
import jax.numpy as jnp
from jax import lax
from jax.experimental import pallas as pl
from jax.experimental.pallas import tpu as pltpu

IN_FEATURES = 1024
OUT_FEATURES = 512

_INV_SQRT2 = 0.7071067811865476  # 1/sqrt(2)


def mlp2_kernel(x_ref, w_ref, b_ref, o_ref):
    """One M-tile: z = x @ W + b, then exact (erf-based) GELU, stored directly."""
    z = jnp.dot(x_ref[...], w_ref[...], preferred_element_type=jnp.float32)
    z = z + b_ref[...]  # (tm, N) + (1, N) broadcast
    # Exact GELU, matching torch.nn.GELU(approximate='none').
    g = 0.5 * z * (1.0 + lax.erf(z * jnp.float32(_INV_SQRT2)))
    o_ref[...] = g.astype(o_ref.dtype)


def _round_up(n, m):
    return ((n + m - 1) // m) * m


def mlp2_forward(x, w, b, *, tm=256):
    """x: [B, 1024] f32, w: [1024, 512] f32 (W^T of torch layout), b: [512] f32."""
    B, K = x.shape
    K2, N = w.shape
    assert K == K2 == IN_FEATURES and N == OUT_FEATURES

    # Pick an M tile: multiple of 8 (sublane), capped at `tm`; pad batch to a
    # multiple of the tile so the grid covers it exactly.
    tile_m = min(tm, _round_up(B, 8))
    Bp = _round_up(B, tile_m)
    if Bp != B:
        x = jnp.pad(x, ((0, Bp - B), (0, 0)))

    b2d = b.reshape(1, N)

    itemsize = jnp.dtype(x.dtype).itemsize
    cost = pl.CostEstimate(
        flops=2 * Bp * K * N,
        transcendentals=Bp * N,  # erf in the epilogue
        bytes_accessed=(Bp * K + K * N + N + Bp * N) * itemsize,
    )

    out = pl.pallas_call(
        mlp2_kernel,
        out_shape=jax.ShapeDtypeStruct((Bp, N), x.dtype),
        grid_spec=pltpu.PrefetchScalarGridSpec(
            num_scalar_prefetch=0,
            grid=(Bp // tile_m,),
            in_specs=[
                pl.BlockSpec((tile_m, K), lambda i: (i, 0)),  # x M-tile, full K
                pl.BlockSpec((K, N), lambda i: (0, 0)),       # W resident in VMEM
                pl.BlockSpec((1, N), lambda i: (0, 0)),       # bias resident
            ],
            out_specs=pl.BlockSpec((tile_m, N), lambda i: (i, 0)),
        ),
        compiler_params=pltpu.CompilerParams(
            dimension_semantics=("parallel",),  # shards M across TCs on v7x
        ),
        cost_estimate=cost,
    )(x, w, b2d)

    return out[:B]


if __name__ == "__main__":
    key = jax.random.PRNGKey(0)
    kx, kw, kb = jax.random.split(key, 3)

    B = 8  # small batch of row vectors, consistent with nn.Linear(1024, 512)
    x = jax.random.normal(kx, (B, IN_FEATURES), dtype=jnp.float32)
    # Deterministic synthetic parameters (shapes match nn.Linear(1024, 512)).
    w = jax.random.normal(kw, (IN_FEATURES, OUT_FEATURES), dtype=jnp.float32) * 0.02
    b = jax.random.normal(kb, (OUT_FEATURES,), dtype=jnp.float32) * 0.02

    out = mlp2_forward(x, w, b)
    out = jax.block_until_ready(out)

    # Sanity check against a pure-JAX reference of the same math.
    z_ref = x @ w + b
    ref = 0.5 * z_ref * (1.0 + lax.erf(z_ref / jnp.sqrt(2.0)))
    assert out.shape == (B, OUT_FEATURES)
    assert jnp.allclose(out, ref, atol=1e-4, rtol=1e-4)

    print("KERNEL_OK")
</pallas_src>

<mosaic_0001>
module attributes {stable_mosaic.version = 11 : i64} {
  func.func @mlp2_kernel(%arg0: i32, %arg1: memref<8x1024xf32, #tpu.memory_space<vmem>>, %arg2: memref<1024x512xf32, #tpu.memory_space<vmem>>, %arg3: memref<1x512xf32, #tpu.memory_space<vmem>>, %arg4: memref<8x512xf32, #tpu.memory_space<vmem>>) attributes {dimension_semantics = [#tpu.dimension_semantics<parallel>], iteration_bounds = array<i64: 1>, scalar_prefetch = 0 : i64, scratch_operands = 0 : i64, tpu.core_type = #tpu.core_type<tc>, window_params = [{transform_indices = @transform_0, window_bounds = array<i64: 8, 1024>}, {pipeline_mode = #tpu.pipeline_mode<synchronous>, transform_indices = @transform_1, window_bounds = array<i64: 1024, 512>}, {pipeline_mode = #tpu.pipeline_mode<synchronous>, transform_indices = @transform_2, window_bounds = array<i64: 1, 512>}, {transform_indices = @transform_3, window_bounds = array<i64: 8, 512>}]} {
    %c0 = arith.constant 0 : index
    %c0_0 = arith.constant 0 : index
    %0 = vector.load %arg1[%c0, %c0_0] : memref<8x1024xf32, #tpu.memory_space<vmem>>, vector<8x1024xf32>
    %c0_1 = arith.constant 0 : index
    %c0_2 = arith.constant 0 : index
    %1 = vector.load %arg2[%c0_1, %c0_2] : memref<1024x512xf32, #tpu.memory_space<vmem>>, vector<1024x512xf32>
    %cst = arith.constant dense<0.000000e+00> : vector<8x512xf32>
    %2 = tpu.matmul %0, %1, %cst {dimension_numbers = #tpu.dot_dimension_numbers<[1], [0], [0], [1], [0, 0, 1, 1], [], []>} : vector<8x1024xf32>, vector<1024x512xf32>, vector<8x512xf32> -> vector<8x512xf32>
    %c0_3 = arith.constant 0 : index
    %c0_4 = arith.constant 0 : index
    %3 = vector.load %arg3[%c0_3, %c0_4] : memref<1x512xf32, #tpu.memory_space<vmem>>, vector<1x512xf32>
    %4 = vector.broadcast %3 : vector<1x512xf32> to vector<8x512xf32>
    %5 = arith.addf %2, %4 : vector<8x512xf32>
    %cst_5 = arith.constant 5.000000e-01 : f32
    %6 = vector.broadcast %cst_5 : f32 to vector<8x512xf32>
    %7 = arith.mulf %6, %5 : vector<8x512xf32>
    %cst_6 = arith.constant 0.707106769 : f32
    %8 = vector.broadcast %cst_6 : f32 to vector<8x512xf32>
    %9 = arith.mulf %5, %8 : vector<8x512xf32>
    %10 = math.erf %9 : vector<8x512xf32>
    %cst_7 = arith.constant 1.000000e+00 : f32
    %11 = vector.broadcast %cst_7 : f32 to vector<8x512xf32>
    %12 = arith.addf %11, %10 : vector<8x512xf32>
    %13 = arith.mulf %7, %12 : vector<8x512xf32>
    %c0_8 = arith.constant 0 : index
    %c0_9 = arith.constant 0 : index
    %14 = vector.load %arg4[%c0_8, %c0_9] : memref<8x512xf32, #tpu.memory_space<vmem>>, vector<8x512xf32>
    tpu.vector_store %arg4[%c0_8, %c0_9], %13 {strides = array<i32>} : memref<8x512xf32, #tpu.memory_space<vmem>>, vector<8x512xf32>,
    return
  }
  func.func @transform_0(%arg0: i32) -> (i32, i32) {
    %c0_i32 = arith.constant 0 : i32
    %c0_i32_0 = arith.constant 0 : i32
    return %arg0, %c0_i32 : i32, i32
  }
  func.func @transform_1(%arg0: i32) -> (i32, i32) {
    %c0_i32 = arith.constant 0 : i32
    %c0_i32_0 = arith.constant 0 : i32
    %c0_i32_1 = arith.constant 0 : i32
    return %c0_i32, %c0_i32_0 : i32, i32
  }
  func.func @transform_2(%arg0: i32) -> (i32, i32) {
    %c0_i32 = arith.constant 0 : i32
    %c0_i32_0 = arith.constant 0 : i32
    %c0_i32_1 = arith.constant 0 : i32
    return %c0_i32, %c0_i32_0 : i32, i32
  }
  func.func @transform_3(%arg0: i32) -> (i32, i32) {
    %c0_i32 = arith.constant 0 : i32
    %c0_i32_0 = arith.constant 0 : i32
    return %arg0, %c0_i32 : i32, i32
  }
}

</mosaic_0001>

<bundles_post_ra>
// kernel: tpu_custom_call.1
= control target key start
LH: loop header
LB: loop body
LE: loop exit
PB: predicated region body
PF: predicated region fallthrough
CT: control target
= control target key end

     0   :  { %8 = vsyncpa [#allocation3], 0  ;;  %s1912_s0 = inlined_call_operand.hbm [shape: f32[8,1024], index: 0, kind: input, shape index: {}]   ;;  %s1913_s1 = inlined_call_operand.hbm [shape: f32[1024,512], index: 1, kind: input, shape index: {}]   ;;  %s1914_s2 = inlined_call_operand.hbm [shape: f32[1,512], index: 2, kind: input, shape index: {}]   ;;  %s1915_s3 = inlined_call_operand.hbm [shape: f32[8,512], index: 3, kind: output, shape index: {}]  }
   0x1   :  { %9 = vsyncpa [#allocation6], 0 }
   0x2   :  { %10 = vsyncpa [#allocation4], 0  ;;  %s1838_s12 = smov [#allocation5]   ;;  %s1744_s16 = scalar_lea.hbm %s1913_s1, 65536 }
   0x3   :  { %s26_s13 = sshll.u32 %s1838_s12, 4  ;;  %p1745_p0 = scmp.ne.s32.totalorder %s1913_s1, %s1744_s16  ;;  %s27_s13 = int_to_ptr.vmem [resolvable:$true] %s26_s13 }
   0x4   :  { %p1748_p1 = scmp.lt.u32.totalorder %s1744_s16, %s1913_s1 }
   0x6   :  { %p1750_p2 = pnand %p1748_p1, %p1745_p0 }
   0x8   :  { %1753 = shalt.err (!%p1750_p2)
}
   0x9   :  { %s1754_s21 = scalar_lea.vmem %s27_s13, 65536  ;;  %p1759_p4 = scmp.lt.s32.totalorder %s27_s13, %s27_s13 }
   0xa   :  { %p1755_p3 = scmp.ne.s32.totalorder %s27_s13, %s1754_s21  ;;  %p1760_p5 = scmp.lt.s32.totalorder %s1754_s21, %s1754_s21 }
   0xc   :  { %p1761_p6 = por %p1760_p5, %p1759_p4 }
   0xe   :  { %p1762_p7 = pnand %p1761_p6, %p1755_p3 }
  0x10   :  { %1765 = shalt.err (!%p1762_p7)
}
  0x11   :  { %s1839_s22 = smov 512   ;;  %s1840_s23 = smov 32  }
  0x12   :  { %32 = dma.hbm_to_vmem [thread:$0]  %s1913_s1, 65536, %s27_s13, [#allocation6], %s1839_s22, %s1839_s22, %s1840_s23  }
  0x13   :  { %s1841_s26 = smov [#allocation2]   ;;  %s1842_s28 = smov [#allocation7]  }
  0x14   :  { %s17_s27 = sshll.u32 %s1841_s26, 4  ;;  %s39_s29 = sshll.u32 %s1842_s28, 4  ;;  %s18_s27 = int_to_ptr.vmem [resolvable:$true] %s17_s27  ;;  %s40_s29 = int_to_ptr.vmem [resolvable:$true] %s39_s29 }
  0x15   :  { %s1766_s5 = scalar_lea.hbm %s1912_s0, 1024 }
  0x16   :  { %p1767_p8 = scmp.ne.s32.totalorder %s1912_s0, %s1766_s5  ;;  %p1770_p9 = scmp.lt.u32.totalorder %s1766_s5, %s1912_s0 }
  0x18   :  { %p1772_p10 = pnand %p1770_p9, %p1767_p8 }
  0x1a   :  { %1775 = shalt.err (!%p1772_p10)
}
  0x1b   :  { %s1776_s1 = scalar_lea.vmem %s18_s27, 1024  ;;  %p1781_p12 = scmp.lt.s32.totalorder %s18_s27, %s18_s27 }
  0x1c   :  { %p1777_p11 = scmp.ne.s32.totalorder %s18_s27, %s1776_s1  ;;  %p1782_p13 = scmp.lt.s32.totalorder %s1776_s1, %s1776_s1 }
  0x1e   :  { %p1783_p0 = por %p1782_p13, %p1781_p12 }
  0x20   :  { %p1784_p1 = pnand %p1783_p0, %p1777_p11 }
  0x22   :  { %1787 = shalt.err (!%p1784_p1)
}
  0x23   :  { %20 = dma.hbm_to_vmem [thread:$0]  %s1912_s0, 1024, %s18_s27, [#allocation3]  }
  0x24   :  { %s1788_s14 = scalar_lea.hbm %s1914_s2, 64 }
  0x25   :  { %p1789_p2 = scmp.ne.s32.totalorder %s1914_s2, %s1788_s14  ;;  %p1792_p3 = scmp.lt.u32.totalorder %s1788_s14, %s1914_s2 }
  0x27   :  { %p1794_p4 = pnand %p1792_p3, %p1789_p2 }
  0x29   :  { %1797 = shalt.err (!%p1794_p4)
}
  0x2a   :  { %s1798_s19 = scalar_lea.vmem %s40_s29, 64  ;;  %p1803_p6 = scmp.lt.s32.totalorder %s40_s29, %s40_s29 }
  0x2b   :  { %p1799_p5 = scmp.ne.s32.totalorder %s40_s29, %s1798_s19  ;;  %p1804_p7 = scmp.lt.s32.totalorder %s1798_s19, %s1798_s19 }
  0x2d   :  { %p1805_p8 = por %p1804_p7, %p1803_p6 }
  0x2f   :  { %p1806_p9 = pnand %p1805_p8, %p1799_p5 }
  0x31   :  { %1809 = shalt.err (!%p1806_p9)
}
  0x32   :  { %42 = dma.hbm_to_vmem [thread:$0]  %s1914_s2, 64, %s40_s29, [#allocation6]  }
  0x33   :  { %1832 = dma.done.wait [#allocation3], 1024  }
  0x34   :  { %1833 = vsyncadd [#allocation3], 4294966272 }
  0x35   :  { %1834 = dma.done.wait [#allocation6], 65600  }
  0x36   :  { %1835 = vsyncadd [#allocation6], 4294901696  ;;  %v61_v0 = vld [vmem:[#allocation5 + $0x8] sm:$0xff]  ;;  %v63_v2 = vld [vmem:[#allocation5 + $0x18] sm:$0xff]  ;;  %s1843_s2 = smov [#allocation8]  }
  0x37   :  { %v65_v1 = vld [vmem:[#allocation5 + $0x28] sm:$0xff]  ;;  %v67_v4 = vld [vmem:[#allocation5 + $0x38] sm:$0xff]  ;;  %v60_v5 = vld [vmem:[#allocation5] sm:$0xff]  ;;  %s1192_s21 = sshll.u32 %s1843_s2, 4  ;;  %s1193_s21 = int_to_ptr.vmem [resolvable:$true] %s1192_s21 }
  0x38   :  { %v1202_v3 = vpack.c.bf16 %v65_v1, %v61_v0  ;;  %v64_v6 = vld [vmem:[#allocation5 + $0x20] sm:$0xff]  ;;  %v1458_v7 = vpack.c.bf16 %v67_v4, %v63_v2  ;;  %v62_v9 = vld [vmem:[#allocation5 + $0x10] sm:$0xff]  ;;  %v69_v11 = vld [vmem:[#allocation5 + $0x48] sm:$0xff]  ;;  %s1810_s22 = scalar_lea.vmem %s1193_s21, 512  ;;  %p1815_p11 = scmp.lt.s32.totalorder %s1193_s21, %s1193_s21 }
  0x39   :  { %v1204_v8 = vpack.c.bf16 %v64_v6, %v60_v5  ;;  %v66_v10 = vld [vmem:[#allocation5 + $0x30] sm:$0xff]  ;;  %v73_v13 = vld [vmem:[#allocation5 + $0x68] sm:$0xff]  ;;  %v71_v14 = vld [vmem:[#allocation5 + $0x58] sm:$0xff]  ;;  %p1811_p10 = scmp.ne.s32.totalorder %s1193_s21, %s1810_s22  ;;  %p1816_p12 = scmp.lt.s32.totalorder %s1810_s22, %s1810_s22 }
  0x3a   :  { %1203 = vmatprep.subr.bf16.mxu0 %v1202_v3  ;;  %v1460_v12 = vpack.c.bf16 %v66_v10, %v62_v9  ;;  %v75_v15 = vld [vmem:[#allocation5 + $0x78] sm:$0xff]  ;;  %1459 = vmatprep.subr.bf16.mxu1 %v1458_v7  ;;  %v1206_v16 = vpack.c.bf16 %v73_v13, %v69_v11  ;;  %v68_v18 = vld [vmem:[#allocation5 + $0x40] sm:$0xff]  ;;  %v70_v20 = vld [vmem:[#allocation5 + $0x50] sm:$0xff] }
  0x3b   :  { %1205 = vmatpush1.bf16.msra.mxu0 %v1204_v8  ;;  %v1462_v17 = vpack.c.bf16 %v75_v15, %v71_v14  ;;  %v72_v19 = vld [vmem:[#allocation5 + $0x60] sm:$0xff]  ;;  %v74_v22 = vld [vmem:[#allocation5 + $0x70] sm:$0xff]  ;;  %v77_v23 = vld [vmem:[#allocation5 + $0x88] sm:$0xff]  ;;  %p1817_p13 = por %p1816_p12, %p1815_p11 }
  0x3c   :  { %1461 = vmatpush1.bf16.msra.mxu1 %v1460_v12  ;;  %v1208_v21 = vpack.c.bf16 %v72_v19, %v68_v18  ;;  %v81_v24 = vld [vmem:[#allocation5 + $0xa8] sm:$0xff]  ;;  %1207 = vmatprep.subr.bf16.mxu0 %v1206_v16  ;;  %v1464_v25 = vpack.c.bf16 %v74_v22, %v70_v20  ;;  %v79_v27 = vld [vmem:[#allocation5 + $0x98] sm:$0xff]  ;;  %v76_v29 = vld [vmem:[#allocation5 + $0x80] sm:$0xff] }
  0x3d   :  { %1463 = vmatprep.subr.bf16.mxu1 %v1462_v17  ;;  %v1210_v26 = vpack.c.bf16 %v81_v24, %v77_v23  ;;  %v83_v28 = vld [vmem:[#allocation5 + $0xb8] sm:$0xff]  ;;  %v80_v31 = vld [vmem:[#allocation5 + $0xa0] sm:$0xff]  ;;  %v78_v32 = vld [vmem:[#allocation5 + $0x90] sm:$0xff]  ;;  %p1818_p0 = pnand %p1817_p13, %p1811_p10 }
  0x3e   :  { %v1466_v30 = vpack.c.bf16 %v83_v28, %v79_v27  ;;  %v82_v33 = vld [vmem:[#allocation5 + $0xb0] sm:$0xff]  ;;  %v1212_v34 = vpack.c.bf16 %v80_v31, %v76_v29  ;;  %v85_v35 = vld [vmem:[#allocation5 + $0xc8] sm:$0xff]  ;;  %v87_v37 = vld [vmem:[#allocation5 + $0xd8] sm:$0xff] }
  0x3f   :  { %1209 = vmatpush1.bf16.msra.mxu0 %v1208_v21  ;;  %v89_v36 = vld [vmem:[#allocation5 + $0xe8] sm:$0xff]  ;;  %v1468_v38 = vpack.c.bf16 %v82_v33, %v78_v32  ;;  %v91_v40 = vld [vmem:[#allocation5 + $0xf8] sm:$0xff]  ;;  %v84_v41 = vld [vmem:[#allocation5 + $0xc0] sm:$0xff] }
  0x40   :  { %1465 = vmatpush1.bf16.msra.mxu1 %v1464_v25  ;;  %1211 = vmatprep.subr.bf16.mxu0 %v1210_v26  ;;  %v1214_v39 = vpack.c.bf16 %v89_v36, %v85_v35  ;;  %v88_v42 = vld [vmem:[#allocation5 + $0xe0] sm:$0xff]  ;;  %v1470_v43 = vpack.c.bf16 %v91_v40, %v87_v37  ;;  %v86_v44 = vld [vmem:[#allocation5 + $0xd0] sm:$0xff]  ;;  %v93_v46 = vld [vmem:[#allocation5 + $0x108] sm:$0xff] }
  0x41   :  { %1467 = vmatprep.subr.bf16.mxu1 %v1466_v30  ;;  %v90_v45 = vld [vmem:[#allocation5 + $0xf0] sm:$0xff]  ;;  %v97_v47 = vld [vmem:[#allocation5 + $0x128] sm:$0xff]  ;;  %v95_v48 = vld [vmem:[#allocation5 + $0x118] sm:$0xff]  ;;  %v1216_v50 = vpack.c.bf16 %v88_v42, %v84_v41 }
  0x42   :  { %v99_v49 = vld [vmem:[#allocation5 + $0x138] sm:$0xff]  ;;  %v1472_v51 = vpack.c.bf16 %v90_v45, %v86_v44  ;;  %v1218_v52 = vpack.c.bf16 %v97_v47, %v93_v46  ;;  %v92_v53 = vld [vmem:[#allocation5 + $0x100] sm:$0xff]  ;;  %v94_v55 = vld [vmem:[#allocation5 + $0x110] sm:$0xff] }
  0x43   :  { %1213 = vmatpush1.bf16.msra.mxu0 %v1212_v34  ;;  %v96_v54 = vld [vmem:[#allocation5 + $0x120] sm:$0xff]  ;;  %v1474_v56 = vpack.c.bf16 %v99_v49, %v95_v48  ;;  %v98_v57 = vld [vmem:[#allocation5 + $0x130] sm:$0xff]  ;;  %v101_v58 = vld [vmem:[#allocation5 + $0x148] sm:$0xff] }
  0x44   :  { %1469 = vmatpush1.bf16.msra.mxu1 %v1468_v38  ;;  %1215 = vmatprep.subr.bf16.mxu0 %v1214_v39  ;;  %v105_v59 = vld [vmem:[#allocation5 + $0x168] sm:$0xff]  ;;  %v103_v60 = vld [vmem:[#allocation5 + $0x158] sm:$0xff]  ;;  %v1220_v62 = vpack.c.bf16 %v96_v54, %v92_v53  ;;  %v1476_v63 = vpack.c.bf16 %v98_v57, %v94_v55  ;;  %v100_v1 = vld [vmem:[#allocation5 + $0x140] sm:$0xff] }
  0x45   :  { %1471 = vmatprep.subr.bf16.mxu1 %v1470_v43  ;;  %v107_v61 = vld [vmem:[#allocation5 + $0x178] sm:$0xff]  ;;  %v1222_v0 = vpack.c.bf16 %v105_v59, %v101_v58  ;;  %v104_v2 = vld [vmem:[#allocation5 + $0x160] sm:$0xff]  ;;  %v102_v3 = vld [vmem:[#allocation5 + $0x150] sm:$0xff] }
  0x46   :  { %v1478_v4 = vpack.c.bf16 %v107_v61, %v103_v60  ;;  %v106_v5 = vld [vmem:[#allocation5 + $0x170] sm:$0xff]  ;;  %v109_v6 = vld [vmem:[#allocation5 + $0x188] sm:$0xff]  ;;  %v111_v8 = vld [vmem:[#allocation5 + $0x198] sm:$0xff]  ;;  %v1224_v10 = vpack.c.bf16 %v104_v2, %v100_v1 }
  0x47   :  { %1217 = vmatpush1.bf16.msra.mxu0 %v1216_v50  ;;  %v113_v7 = vld [vmem:[#allocation5 + $0x1a8] sm:$0xff]  ;;  %v115_v9 = vld [vmem:[#allocation5 + $0x1b8] sm:$0xff]  ;;  %v1480_v11 = vpack.c.bf16 %v106_v5, %v102_v3  ;;  %v108_v13 = vld [vmem:[#allocation5 + $0x180] sm:$0xff] }
  0x48   :  { %1473 = vmatpush1.bf16.msra.mxu1 %v1472_v51  ;;  %1219 = vmatprep.subr.bf16.mxu0 %v1218_v52  ;;  %v1226_v12 = vpack.c.bf16 %v113_v7, %v109_v6  ;;  %v112_v14 = vld [vmem:[#allocation5 + $0x1a0] sm:$0xff]  ;;  %v110_v15 = vld [vmem:[#allocation5 + $0x190] sm:$0xff]  ;;  %v1482_v16 = vpack.c.bf16 %v115_v9, %v111_v8  ;;  %v117_v18 = vld [vmem:[#allocation5 + $0x1c8] sm:$0xff] }
  0x49   :  { %1475 = vmatprep.subr.bf16.mxu1 %v1474_v56  ;;  %v114_v17 = vld [vmem:[#allocation5 + $0x1b0] sm:$0xff]  ;;  %v121_v19 = vld [vmem:[#allocation5 + $0x1e8] sm:$0xff]  ;;  %v119_v20 = vld [vmem:[#allocation5 + $0x1d8] sm:$0xff]  ;;  %v1228_v22 = vpack.c.bf16 %v112_v14, %v108_v13 }
  0x4a   :  { %v123_v21 = vld [vmem:[#allocation5 + $0x1f8] sm:$0xff]  ;;  %v1484_v23 = vpack.c.bf16 %v114_v17, %v110_v15  ;;  %v1230_v24 = vpack.c.bf16 %v121_v19, %v117_v18  ;;  %v116_v25 = vld [vmem:[#allocation5 + $0x1c0] sm:$0xff]  ;;  %v118_v27 = vld [vmem:[#allocation5 + $0x1d0] sm:$0xff] }
  0x4b   :  { %1221 = vmatpush1.bf16.msra.mxu0 %v1220_v62  ;;  %v120_v26 = vld [vmem:[#allocation5 + $0x1e0] sm:$0xff]  ;;  %v1486_v28 = vpack.c.bf16 %v123_v21, %v119_v20  ;;  %v122_v29 = vld [vmem:[#allocation5 + $0x1f0] sm:$0xff]  ;;  %v125_v30 = vld [vmem:[#allocation5 + $0x208] sm:$0xff] }
  0x4c   :  { %1477 = vmatpush1.bf16.msra.mxu1 %v1476_v63  ;;  %1223 = vmatprep.subr.bf16.mxu0 %v1222_v0  ;;  %v129_v31 = vld [vmem:[#allocation5 + $0x228] sm:$0xff]  ;;  %v127_v32 = vld [vmem:[#allocation5 + $0x218] sm:$0xff]  ;;  %v1232_v34 = vpack.c.bf16 %v120_v26, %v116_v25  ;;  %v1488_v35 = vpack.c.bf16 %v122_v29, %v118_v27  ;;  %v124_v37 = vld [vmem:[#allocation5 + $0x200] sm:$0xff] }
  0x4d   :  { %1479 = vmatprep.subr.bf16.mxu1 %v1478_v4  ;;  %v131_v33 = vld [vmem:[#allocation5 + $0x238] sm:$0xff]  ;;  %v1234_v36 = vpack.c.bf16 %v129_v31, %v125_v30  ;;  %v128_v38 = vld [vmem:[#allocation5 + $0x220] sm:$0xff]  ;;  %v126_v39 = vld [vmem:[#allocation5 + $0x210] sm:$0xff] }
  0x4e   :  { %v1490_v40 = vpack.c.bf16 %v131_v33, %v127_v32  ;;  %v130_v41 = vld [vmem:[#allocation5 + $0x230] sm:$0xff]  ;;  %v133_v42 = vld [vmem:[#allocation5 + $0x248] sm:$0xff]  ;;  %v135_v44 = vld [vmem:[#allocation5 + $0x258] sm:$0xff]  ;;  %v1236_v46 = vpack.c.bf16 %v128_v38, %v124_v37 }
  0x4f   :  { %1225 = vmatpush1.bf16.msra.mxu0 %v1224_v10  ;;  %v137_v43 = vld [vmem:[#allocation5 + $0x268] sm:$0xff]  ;;  %v139_v45 = vld [vmem:[#allocation5 + $0x278] sm:$0xff]  ;;  %v1492_v47 = vpack.c.bf16 %v130_v41, %v126_v39  ;;  %v132_v49 = vld [vmem:[#allocation5 + $0x240] sm:$0xff] }
  0x50   :  { %1481 = vmatpush1.bf16.msra.mxu1 %v1480_v11  ;;  %1227 = vmatprep.subr.bf16.mxu0 %v1226_v12  ;;  %v1238_v48 = vpack.c.bf16 %v137_v43, %v133_v42  ;;  %v136_v50 = vld [vmem:[#allocation5 + $0x260] sm:$0xff]  ;;  %v134_v51 = vld [vmem:[#allocation5 + $0x250] sm:$0xff]  ;;  %v1494_v52 = vpack.c.bf16 %v139_v45, %v135_v44  ;;  %v141_v54 = vld [vmem:[#allocation5 + $0x288] sm:$0xff] }
  0x51   :  { %1483 = vmatprep.subr.bf16.mxu1 %v1482_v16  ;;  %v138_v53 = vld [vmem:[#allocation5 + $0x270] sm:$0xff]  ;;  %v145_v55 = vld [vmem:[#allocation5 + $0x2a8] sm:$0xff]  ;;  %v143_v56 = vld [vmem:[#allocation5 + $0x298] sm:$0xff]  ;;  %v1240_v58 = vpack.c.bf16 %v136_v50, %v132_v49 }
  0x52   :  { %v147_v57 = vld [vmem:[#allocation5 + $0x2b8] sm:$0xff]  ;;  %v1496_v59 = vpack.c.bf16 %v138_v53, %v134_v51  ;;  %v1242_v60 = vpack.c.bf16 %v145_v55, %v141_v54  ;;  %v140_v61 = vld [vmem:[#allocation5 + $0x280] sm:$0xff]  ;;  %v142_v63 = vld [vmem:[#allocation5 + $0x290] sm:$0xff] }
  0x53   :  { %1229 = vmatpush1.bf16.msra.mxu0 %v1228_v22  ;;  %v144_v62 = vld [vmem:[#allocation5 + $0x2a0] sm:$0xff]  ;;  %v1498_v0 = vpack.c.bf16 %v147_v57, %v143_v56  ;;  %v146_v1 = vld [vmem:[#allocation5 + $0x2b0] sm:$0xff]  ;;  %v149_v2 = vld [vmem:[#allocation5 + $0x2c8] sm:$0xff] }
  0x54   :  { %1485 = vmatpush1.bf16.msra.mxu1 %v1484_v23  ;;  %1231 = vmatprep.subr.bf16.mxu0 %v1230_v24  ;;  %v153_v3 = vld [vmem:[#allocation5 + $0x2e8] sm:$0xff]  ;;  %v151_v4 = vld [vmem:[#allocation5 + $0x2d8] sm:$0xff]  ;;  %v1244_v6 = vpack.c.bf16 %v144_v62, %v140_v61  ;;  %v148_v7 = vld [vmem:[#allocation5 + $0x2c0] sm:$0xff]  ;;  %v1500_v8 = vpack.c.bf16 %v146_v1, %v142_v63 }
  0x55   :  { %1487 = vmatprep.subr.bf16.mxu1 %v1486_v28  ;;  %v155_v5 = vld [vmem:[#allocation5 + $0x2f8] sm:$0xff]  ;;  %v1246_v9 = vpack.c.bf16 %v153_v3, %v149_v2  ;;  %v152_v10 = vld [vmem:[#allocation5 + $0x2e0] sm:$0xff]  ;;  %v150_v11 = vld [vmem:[#allocation5 + $0x2d0] sm:$0xff] }
  0x56   :  { %v154_v12 = vld [vmem:[#allocation5 + $0x2f0] sm:$0xff]  ;;  %v1502_v13 = vpack.c.bf16 %v155_v5, %v151_v4  ;;  %v157_v14 = vld [vmem:[#allocation5 + $0x308] sm:$0xff]  ;;  %v159_v17 = vld [vmem:[#allocation5 + $0x318] sm:$0xff]  ;;  %v1248_v19 = vpack.c.bf16 %v152_v10, %v148_v7 }
  0x57   :  { %1233 = vmatpush1.bf16.msra.mxu0 %v1232_v34  ;;  %v161_v15 = vld [vmem:[#allocation5 + $0x328] sm:$0xff]  ;;  %v163_v18 = vld [vmem:[#allocation5 + $0x338] sm:$0xff]  ;;  %v1504_v20 = vpack.c.bf16 %v154_v12, %v150_v11  ;;  %v156_v22 = vld [vmem:[#allocation5 + $0x300] sm:$0xff] }
  0x58   :  { %1489 = vmatpush1.bf16.msra.mxu1 %v1488_v35  ;;  %1235 = vmatprep.subr.bf16.mxu0 %v1234_v36  ;;  %v53_v16 = vld [vmem:[#allocation2 + $0x8] sm:$0xff]  ;;  %v1250_v21 = vpack.c.bf16 %v161_v15, %v157_v14  ;;  %v160_v23 = vld [vmem:[#allocation5 + $0x320] sm:$0xff]  ;;  %v158_v24 = vld [vmem:[#allocation5 + $0x310] sm:$0xff]  ;;  %v1506_v25 = vpack.c.bf16 %v163_v18, %v159_v17 }
  0x59   :  { %1491 = vmatprep.subr.bf16.mxu1 %v1490_v40  ;;  %658 = vmatprep.mubr.f32.mxu0 %v53_v16  ;;  %v162_v26 = vld [vmem:[#allocation5 + $0x330] sm:$0xff]  ;;  %v165_v27 = vld [vmem:[#allocation5 + $0x348] sm:$0xff]  ;;  %v167_v29 = vld [vmem:[#allocation5 + $0x358] sm:$0xff]  ;;  %v1252_v31 = vpack.c.bf16 %v160_v23, %v156_v22 }
  0x5a   :  { %942 = vmatprep.mubr.f32.mxu1 %v53_v16  ;;  %v169_v28 = vld [vmem:[#allocation5 + $0x368] sm:$0xff]  ;;  %v171_v30 = vld [vmem:[#allocation5 + $0x378] sm:$0xff]  ;;  %v1508_v32 = vpack.c.bf16 %v162_v26, %v158_v24  ;;  %v164_v34 = vld [vmem:[#allocation5 + $0x340] sm:$0xff] }
  0x5b   :  { %1237 = vmatpush1.bf16.msra.mxu0 %v1236_v46  ;;  %v1254_v33 = vpack.c.bf16 %v169_v28, %v165_v27  ;;  %v168_v35 = vld [vmem:[#allocation5 + $0x360] sm:$0xff]  ;;  %v166_v36 = vld [vmem:[#allocation5 + $0x350] sm:$0xff]  ;;  %v1510_v37 = vpack.c.bf16 %v171_v30, %v167_v29  ;;  %v173_v39 = vld [vmem:[#allocation5 + $0x388] sm:$0xff] }
  0x5c   :  { %1493 = vmatpush1.bf16.msra.mxu1 %v1492_v47  ;;  %1239 = vmatprep.subr.bf16.mxu0 %v1238_v48  ;;  %v170_v38 = vld [vmem:[#allocation5 + $0x370] sm:$0xff]  ;;  %v177_v40 = vld [vmem:[#allocation5 + $0x3a8] sm:$0xff]  ;;  %v175_v41 = vld [vmem:[#allocation5 + $0x398] sm:$0xff]  ;;  %v1256_v43 = vpack.c.bf16 %v168_v35, %v164_v34 }
  0x5d   :  { %1495 = vmatprep.subr.bf16.mxu1 %v1494_v52  ;;  %v179_v42 = vld [vmem:[#allocation5 + $0x3b8] sm:$0xff]  ;;  %v1512_v44 = vpack.c.bf16 %v170_v38, %v166_v36  ;;  %v1258_v45 = vpack.c.bf16 %v177_v40, %v173_v39  ;;  %v172_v46 = vld [vmem:[#allocation5 + $0x380] sm:$0xff]  ;;  %v174_v48 = vld [vmem:[#allocation5 + $0x390] sm:$0xff] }
  0x5e   :  { %v176_v47 = vld [vmem:[#allocation5 + $0x3a0] sm:$0xff]  ;;  %v1514_v49 = vpack.c.bf16 %v179_v42, %v175_v41  ;;  %v178_v50 = vld [vmem:[#allocation5 + $0x3b0] sm:$0xff]  ;;  %v181_v51 = vld [vmem:[#allocation5 + $0x3c8] sm:$0xff] }
  0x5f   :  { %1241 = vmatpush1.bf16.msra.mxu0 %v1240_v58  ;;  %v185_v52 = vld [vmem:[#allocation5 + $0x3e8] sm:$0xff]  ;;  %v183_v53 = vld [vmem:[#allocation5 + $0x3d8] sm:$0xff]  ;;  %v1260_v55 = vpack.c.bf16 %v176_v47, %v172_v46  ;;  %v1516_v56 = vpack.c.bf16 %v178_v50, %v174_v48  ;;  %v180_v58 = vld [vmem:[#allocation5 + $0x3c0] sm:$0xff] }
  0x60   :  { %1497 = vmatpush1.bf16.msra.mxu1 %v1496_v59  ;;  %1243 = vmatprep.subr.bf16.mxu0 %v1242_v60  ;;  %v187_v54 = vld [vmem:[#allocation5 + $0x3f8] sm:$0xff]  ;;  %v1262_v57 = vpack.c.bf16 %v185_v52, %v181_v51  ;;  %v184_v59 = vld [vmem:[#allocation5 + $0x3e0] sm:$0xff]  ;;  %v182_v60 = vld [vmem:[#allocation5 + $0x3d0] sm:$0xff] }
  0x61   :  { %1499 = vmatprep.subr.bf16.mxu1 %v1498_v0  ;;  %v1518_v61 = vpack.c.bf16 %v187_v54, %v183_v53  ;;  %v186_v62 = vld [vmem:[#allocation5 + $0x3f0] sm:$0xff]  ;;  %v189_v63 = vld [vmem:[#allocation5 + $0x408] sm:$0xff]  ;;  %v191_v1 = vld [vmem:[#allocation5 + $0x418] sm:$0xff]  ;;  %v1264_v3 = vpack.c.bf16 %v184_v59, %v180_v58 }
  0x62   :  { %v193_v0 = vld [vmem:[#allocation5 + $0x428] sm:$0xff]  ;;  %v195_v2 = vld [vmem:[#allocation5 + $0x438] sm:$0xff]  ;;  %v1520_v4 = vpack.c.bf16 %v186_v62, %v182_v60  ;;  %v192_v7 = vld [vmem:[#allocation5 + $0x420] sm:$0xff] }
  0x63   :  { %1245 = vmatpush1.bf16.msra.mxu0 %v1244_v6  ;;  %v1266_v5 = vpack.c.bf16 %v193_v0, %v189_v63  ;;  %v188_v6 = vld [vmem:[#allocation5 + $0x400] sm:$0xff]  ;;  %v194_v10 = vld [vmem:[#allocation5 + $0x430] sm:$0xff]  ;;  %v197_v11 = vld [vmem:[#allocation5 + $0x448] sm:$0xff] }
  0x64   :  { %1501 = vmatpush1.bf16.msra.mxu1 %v1500_v8  ;;  %1247 = vmatprep.subr.bf16.mxu0 %v1246_v9  ;;  %v190_v8 = vld [vmem:[#allocation5 + $0x410] sm:$0xff]  ;;  %v1522_v9 = vpack.c.bf16 %v195_v2, %v191_v1  ;;  %v201_v12 = vld [vmem:[#allocation5 + $0x468] sm:$0xff]  ;;  %v203_v14 = vld [vmem:[#allocation5 + $0x478] sm:$0xff]  ;;  %v1268_v16 = vpack.c.bf16 %v192_v7, %v188_v6 }
  0x65   :  { %1503 = vmatprep.subr.bf16.mxu1 %v1502_v13  ;;  %v199_v13 = vld [vmem:[#allocation5 + $0x458] sm:$0xff]  ;;  %v52_v15 = vld [vmem:[#allocation2] sm:$0xff]  ;;  %v1524_v17 = vpack.c.bf16 %v194_v10, %v190_v8  ;;  %v1270_v18 = vpack.c.bf16 %v201_v12, %v197_v11  ;;  %v202_v23 = vld [vmem:[#allocation5 + $0x470] sm:$0xff] }
  0x66   :  { %v1526_v22 = vpack.c.bf16 %v203_v14, %v199_v13  ;;  %v205_v24 = vld [vmem:[#allocation5 + $0x488] sm:$0xff]  ;;  %v207_v26 = vld [vmem:[#allocation5 + $0x498] sm:$0xff]  ;;  %v210_v35 = vld [vmem:[#allocation5 + $0x4b0] sm:$0xff] }
  0x67   :  { %1249 = vmatpush1.bf16.msra.mxu0 %v1248_v19  ;;  %v196_v19 = vld [vmem:[#allocation5 + $0x440] sm:$0xff]  ;;  %v211_v27 = vld [vmem:[#allocation5 + $0x4b8] sm:$0xff]  ;;  %v213_v36 = vld [vmem:[#allocation5 + $0x4c8] sm:$0xff] }
  0x68   :  { %1505 = vmatpush1.bf16.msra.mxu1 %v1504_v20  ;;  %1251 = vmatprep.subr.bf16.mxu0 %v1250_v21  ;;  %v200_v20 = vld [vmem:[#allocation5 + $0x460] sm:$0xff]  ;;  %v198_v21 = vld [vmem:[#allocation5 + $0x450] sm:$0xff]  ;;  %v1530_v34 = vpack.c.bf16 %v211_v27, %v207_v26  ;;  %v215_v38 = vld [vmem:[#allocation5 + $0x4d8] sm:$0xff] }
  0x69   :  { %1507 = vmatprep.subr.bf16.mxu1 %v1506_v25  ;;  %v209_v25 = vld [vmem:[#allocation5 + $0x4a8] sm:$0xff]  ;;  %v1272_v28 = vpack.c.bf16 %v200_v20, %v196_v19  ;;  %v1528_v29 = vpack.c.bf16 %v202_v23, %v198_v21  ;;  %v219_v39 = vld [vmem:[#allocation5 + $0x4f8] sm:$0xff]  ;;  %v218_v47 = vld [vmem:[#allocation5 + $0x4f0] sm:$0xff] }
  0x6a   :  { %v1274_v30 = vpack.c.bf16 %v209_v25, %v205_v24  ;;  %v1534_v46 = vpack.c.bf16 %v219_v39, %v215_v38  ;;  %v221_v48 = vld [vmem:[#allocation5 + $0x508] sm:$0xff]  ;;  %v223_v50 = vld [vmem:[#allocation5 + $0x518] sm:$0xff]  ;;  %v226_v59 = vld [vmem:[#allocation5 + $0x530] sm:$0xff] }
  0x6b   :  { %1253 = vmatpush1.bf16.msra.mxu0 %v1252_v31  ;;  %v204_v31 = vld [vmem:[#allocation5 + $0x480] sm:$0xff]  ;;  %v227_v51 = vld [vmem:[#allocation5 + $0x538] sm:$0xff]  ;;  %v229_v60 = vld [vmem:[#allocation5 + $0x548] sm:$0xff] }
  0x6c   :  { %1509 = vmatpush1.bf16.msra.mxu1 %v1508_v32  ;;  %1255 = vmatprep.subr.bf16.mxu0 %v1254_v33  ;;  %v208_v32 = vld [vmem:[#allocation5 + $0x4a0] sm:$0xff]  ;;  %v206_v33 = vld [vmem:[#allocation5 + $0x490] sm:$0xff]  ;;  %v1538_v58 = vpack.c.bf16 %v227_v51, %v223_v50  ;;  %v231_v62 = vld [vmem:[#allocation5 + $0x558] sm:$0xff] }
  0x6d   :  { %1511 = vmatprep.subr.bf16.mxu1 %v1510_v37  ;;  %v217_v37 = vld [vmem:[#allocation5 + $0x4e8] sm:$0xff]  ;;  %v1276_v40 = vpack.c.bf16 %v208_v32, %v204_v31  ;;  %v1532_v41 = vpack.c.bf16 %v210_v35, %v206_v33  ;;  %v235_v63 = vld [vmem:[#allocation5 + $0x578] sm:$0xff]  ;;  %v234_v7 = vld [vmem:[#allocation5 + $0x570] sm:$0xff] }
  0x6e   :  { %v1278_v42 = vpack.c.bf16 %v217_v37, %v213_v36  ;;  %v1542_v6 = vpack.c.bf16 %v235_v63, %v231_v62  ;;  %v237_v8 = vld [vmem:[#allocation5 + $0x588] sm:$0xff]  ;;  %v239_v10 = vld [vmem:[#allocation5 + $0x598] sm:$0xff]  ;;  %v236_v13 = vld [vmem:[#allocation5 + $0x580] sm:$0xff] }
  0x6f   :  { %1257 = vmatpush1.bf16.msra.mxu0 %v1256_v43  ;;  %v212_v43 = vld [vmem:[#allocation5 + $0x4c0] sm:$0xff]  ;;  %v243_v11 = vld [vmem:[#allocation5 + $0x5b8] sm:$0xff]  ;;  %v245_v20 = vld [vmem:[#allocation5 + $0x5c8] sm:$0xff] }
  0x70   :  { %1513 = vmatpush1.bf16.msra.mxu1 %v1512_v44  ;;  %1259 = vmatprep.subr.bf16.mxu0 %v1258_v45  ;;  %v216_v44 = vld [vmem:[#allocation5 + $0x4e0] sm:$0xff]  ;;  %v214_v45 = vld [vmem:[#allocation5 + $0x4d0] sm:$0xff]  ;;  %v1546_v19 = vpack.c.bf16 %v243_v11, %v239_v10  ;;  %v249_v21 = vld [vmem:[#allocation5 + $0x5e8] sm:$0xff] }
  0x71   :  { %1515 = vmatprep.subr.bf16.mxu1 %v1514_v49  ;;  %v225_v49 = vld [vmem:[#allocation5 + $0x528] sm:$0xff]  ;;  %v1280_v52 = vpack.c.bf16 %v216_v44, %v212_v43  ;;  %v1536_v53 = vpack.c.bf16 %v218_v47, %v214_v45  ;;  %v247_v23 = vld [vmem:[#allocation5 + $0x5d8] sm:$0xff]  ;;  %v1294_v27 = vpack.c.bf16 %v249_v21, %v245_v20  ;;  %v250_v32 = vld [vmem:[#allocation5 + $0x5f0] sm:$0xff] }
  0x72   :  { %v1282_v54 = vpack.c.bf16 %v225_v49, %v221_v48  ;;  %v251_v24 = vld [vmem:[#allocation5 + $0x5f8] sm:$0xff]  ;;  %v253_v33 = vld [vmem:[#allocation5 + $0x608] sm:$0xff]  ;;  %v258_v44 = vld [vmem:[#allocation5 + $0x630] sm:$0xff] }
  0x73   :  { %1261 = vmatpush1.bf16.msra.mxu0 %v1260_v55  ;;  %v220_v55 = vld [vmem:[#allocation5 + $0x500] sm:$0xff]  ;;  %v1550_v31 = vpack.c.bf16 %v251_v24, %v247_v23  ;;  %v255_v35 = vld [vmem:[#allocation5 + $0x618] sm:$0xff]  ;;  %v261_v45 = vld [vmem:[#allocation5 + $0x648] sm:$0xff] }
  0x74   :  { %1517 = vmatpush1.bf16.msra.mxu1 %v1516_v56  ;;  %1263 = vmatprep.subr.bf16.mxu0 %v1262_v57  ;;  %v224_v56 = vld [vmem:[#allocation5 + $0x520] sm:$0xff]  ;;  %v222_v57 = vld [vmem:[#allocation5 + $0x510] sm:$0xff]  ;;  %v259_v36 = vld [vmem:[#allocation5 + $0x638] sm:$0xff] }
  0x75   :  { %1519 = vmatprep.subr.bf16.mxu1 %v1518_v61  ;;  %v233_v61 = vld [vmem:[#allocation5 + $0x568] sm:$0xff]  ;;  %v1284_v0 = vpack.c.bf16 %v224_v56, %v220_v55  ;;  %v1540_v1 = vpack.c.bf16 %v226_v59, %v222_v57  ;;  %v1554_v43 = vpack.c.bf16 %v259_v36, %v255_v35  ;;  %v263_v47 = vld [vmem:[#allocation5 + $0x658] sm:$0xff]  ;;  %v266_v56 = vld [vmem:[#allocation5 + $0x670] sm:$0xff] }
  0x76   :  { %v1286_v2 = vpack.c.bf16 %v233_v61, %v229_v60  ;;  %v267_v48 = vld [vmem:[#allocation5 + $0x678] sm:$0xff]  ;;  %v269_v57 = vld [vmem:[#allocation5 + $0x688] sm:$0xff]  ;;  %v284_v24 = vld [vmem:[#allocation5 + $0x700] sm:$0xff] }
  0x77   :  { %1265 = vmatpush1.bf16.msra.mxu0 %v1264_v3  ;;  %v228_v3 = vld [vmem:[#allocation5 + $0x540] sm:$0xff]  ;;  %v1558_v55 = vpack.c.bf16 %v267_v48, %v263_v47  ;;  %v271_v59 = vld [vmem:[#allocation5 + $0x698] sm:$0xff] }
  0x78   :  { %1521 = vmatpush1.bf16.msra.mxu1 %v1520_v4  ;;  %1267 = vmatprep.subr.bf16.mxu0 %v1266_v5  ;;  %v232_v4 = vld [vmem:[#allocation5 + $0x560] sm:$0xff]  ;;  %v230_v5 = vld [vmem:[#allocation5 + $0x550] sm:$0xff]  ;;  %v275_v60 = vld [vmem:[#allocation5 + $0x6b8] sm:$0xff] }
  0x79   :  { %1523 = vmatprep.subr.bf16.mxu1 %v1522_v9  ;;  %v241_v9 = vld [vmem:[#allocation5 + $0x5a8] sm:$0xff]  ;;  %v1288_v12 = vpack.c.bf16 %v232_v4, %v228_v3  ;;  %v1544_v14 = vpack.c.bf16 %v234_v7, %v230_v5  ;;  %v1562_v3 = vpack.c.bf16 %v275_v60, %v271_v59  ;;  %v274_v4 = vld [vmem:[#allocation5 + $0x6b0] sm:$0xff]  ;;  %v279_v7 = vld [vmem:[#allocation5 + $0x6d8] sm:$0xff] }
  0x7a   :  { %659 = vmatmul.mubr.f32.vlgmr.msra.gmra.mrb[0].mxu0 %v52_v15  ;;  %v277_v5 = vld [vmem:[#allocation5 + $0x6c8] sm:$0xff]  ;;  %v291_v20 = vld [vmem:[#allocation5 + $0x738] sm:$0xff]  ;;  %v292_v36 = vld [vmem:[#allocation5 + $0x740] sm:$0xff] }
  0x7b   :  { %1269 = vmatpush1.bf16.msra.mxu0 %v1268_v16  ;;  %943 = vmatmul.mubr.f32.vlgmr.msra.gmra.mrb[0].mxu1 %v52_v15  ;;  %v1290_v15 = vpack.c.bf16 %v241_v9, %v237_v8  ;;  %v240_v16 = vld [vmem:[#allocation5 + $0x5a0] sm:$0xff]  ;;  %v283_v8 = vld [vmem:[#allocation5 + $0x6f8] sm:$0xff] }
  0x7c   :  { %1525 = vmatpush1.bf16.msra.mxu1 %v1524_v17  ;;  %1271 = vmatprep.subr.bf16.mxu0 %v1270_v18  ;;  %v238_v17 = vld [vmem:[#allocation5 + $0x590] sm:$0xff]  ;;  %v1292_v25 = vpack.c.bf16 %v240_v16, %v236_v13  ;;  %v280_v13 = vld [vmem:[#allocation5 + $0x6e0] sm:$0xff] }
  0x7d   :  { %1527 = vmatprep.subr.bf16.mxu1 %v1526_v22  ;;  %v242_v18 = vld [vmem:[#allocation5 + $0x5b0] sm:$0xff]  ;;  %v55_v22 = vld [vmem:[#allocation2 + $0x18] sm:$0xff]  ;;  %v300_v48 = vld [vmem:[#allocation5 + $0x780] sm:$0xff] }
  0x7e   :  { %729 = vmatprep.mubr.f32.mxu0 %v55_v22  ;;  %1013 = vmatprep.mubr.f32.mxu1 %v55_v22  ;;  %v1548_v26 = vpack.c.bf16 %v242_v18, %v238_v17  ;;  %v282_v16 = vld [vmem:[#allocation5 + $0x6f0] sm:$0xff]  ;;  %v285_v17 = vld [vmem:[#allocation5 + $0x708] sm:$0xff]  ;;  %v308_v60 = vld [vmem:[#allocation5 + $0x7c0] sm:$0xff] }
  0x7f   :  { %1273 = vmatpush1.bf16.msra.mxu0 %v1272_v28  ;;  %v244_v28 = vld [vmem:[#allocation5 + $0x5c0] sm:$0xff]  ;;  %v289_v18 = vld [vmem:[#allocation5 + $0x728] sm:$0xff] }
  0x80   :  { %1529 = vmatpush1.bf16.msra.mxu1 %v1528_v29  ;;  %1275 = vmatprep.subr.bf16.mxu0 %v1274_v30  ;;  %v248_v29 = vld [vmem:[#allocation5 + $0x5e0] sm:$0xff]  ;;  %v246_v30 = vld [vmem:[#allocation5 + $0x5d0] sm:$0xff]  ;;  %v1314_v23 = vpack.c.bf16 %v289_v18, %v285_v17 }
  0x81   :  { %1531 = vmatprep.subr.bf16.mxu1 %v1530_v34  ;;  %v257_v34 = vld [vmem:[#allocation5 + $0x628] sm:$0xff]  ;;  %v1296_v37 = vpack.c.bf16 %v248_v29, %v244_v28  ;;  %v1552_v38 = vpack.c.bf16 %v250_v32, %v246_v30  ;;  %v290_v28 = vld [vmem:[#allocation5 + $0x730] sm:$0xff]  ;;  %v299_v32 = vld [vmem:[#allocation5 + $0x778] sm:$0xff] }
  0x82   :  { %v1298_v39 = vpack.c.bf16 %v257_v34, %v253_v33  ;;  %v293_v29 = vld [vmem:[#allocation5 + $0x748] sm:$0xff]  ;;  %v54_v17 = vld [vmem:[#allocation2 + $0x10] sm:$0xff] }
  0x83   :  { %1277 = vmatpush1.bf16.msra.mxu0 %v1276_v40  ;;  %v252_v40 = vld [vmem:[#allocation5 + $0x600] sm:$0xff]  ;;  %v297_v30 = vld [vmem:[#allocation5 + $0x768] sm:$0xff] }
  0x84   :  { %1533 = vmatpush1.bf16.msra.mxu1 %v1532_v41  ;;  %1279 = vmatprep.subr.bf16.mxu0 %v1278_v42  ;;  %v256_v41 = vld [vmem:[#allocation5 + $0x620] sm:$0xff]  ;;  %v254_v42 = vld [vmem:[#allocation5 + $0x610] sm:$0xff]  ;;  %v1318_v35 = vpack.c.bf16 %v297_v30, %v293_v29  ;;  %v339_v29 = vld [vmem:[#allocation5 + $0x8b8] sm:$0xff] }
  0x85   :  { %1535 = vmatprep.subr.bf16.mxu1 %v1534_v46  ;;  %v265_v46 = vld [vmem:[#allocation5 + $0x668] sm:$0xff]  ;;  %v1300_v49 = vpack.c.bf16 %v256_v41, %v252_v40  ;;  %v1556_v50 = vpack.c.bf16 %v258_v44, %v254_v42  ;;  %v298_v40 = vld [vmem:[#allocation5 + $0x770] sm:$0xff]  ;;  %v307_v44 = vld [vmem:[#allocation5 + $0x7b8] sm:$0xff] }
  0x86   :  { %v1302_v51 = vpack.c.bf16 %v265_v46, %v261_v45  ;;  %v301_v41 = vld [vmem:[#allocation5 + $0x788] sm:$0xff] }
  0x87   :  { %1281 = vmatpush1.bf16.msra.mxu0 %v1280_v52  ;;  %v260_v52 = vld [vmem:[#allocation5 + $0x640] sm:$0xff]  ;;  %v305_v42 = vld [vmem:[#allocation5 + $0x7a8] sm:$0xff] }
  0x88   :  { %1537 = vmatpush1.bf16.msra.mxu1 %v1536_v53  ;;  %1283 = vmatprep.subr.bf16.mxu0 %v1282_v54  ;;  %v264_v53 = vld [vmem:[#allocation5 + $0x660] sm:$0xff]  ;;  %v262_v54 = vld [vmem:[#allocation5 + $0x650] sm:$0xff]  ;;  %v1322_v47 = vpack.c.bf16 %v305_v42, %v301_v41  ;;  %v57_v30 = vld [vmem:[#allocation2 + $0x28] sm:$0xff] }
  0x89   :  { %1539 = vmatprep.subr.bf16.mxu1 %v1538_v58  ;;  %v273_v58 = vld [vmem:[#allocation5 + $0x6a8] sm:$0xff]  ;;  %v1304_v61 = vpack.c.bf16 %v264_v53, %v260_v52  ;;  %v1560_v62 = vpack.c.bf16 %v266_v56, %v262_v54  ;;  %v306_v52 = vld [vmem:[#allocation5 + $0x7b0] sm:$0xff]  ;;  %v315_v56 = vld [vmem:[#allocation5 + $0x7f8] sm:$0xff] }
  0x8a   :  { %v1306_v63 = vpack.c.bf16 %v273_v58, %v269_v57  ;;  %v309_v53 = vld [vmem:[#allocation5 + $0x7c8] sm:$0xff]  ;;  %v343_v41 = vld [vmem:[#allocation5 + $0x8d8] sm:$0xff] }
  0x8b   :  { %1285 = vmatpush1.bf16.msra.mxu0 %v1284_v0  ;;  %v268_v0 = vld [vmem:[#allocation5 + $0x680] sm:$0xff]  ;;  %v313_v54 = vld [vmem:[#allocation5 + $0x7e8] sm:$0xff]  ;;  %v347_v42 = vld [vmem:[#allocation5 + $0x8f8] sm:$0xff] }
  0x8c   :  { %1541 = vmatpush1.bf16.msra.mxu1 %v1540_v1  ;;  %1287 = vmatprep.subr.bf16.mxu0 %v1286_v2  ;;  %v272_v1 = vld [vmem:[#allocation5 + $0x6a0] sm:$0xff]  ;;  %v270_v2 = vld [vmem:[#allocation5 + $0x690] sm:$0xff]  ;;  %v1326_v59 = vpack.c.bf16 %v313_v54, %v309_v53  ;;  %v351_v53 = vld [vmem:[#allocation5 + $0x918] sm:$0xff] }
  0x8d   :  { %1543 = vmatprep.subr.bf16.mxu1 %v1542_v6  ;;  %v281_v6 = vld [vmem:[#allocation5 + $0x6e8] sm:$0xff]  ;;  %v1308_v9 = vpack.c.bf16 %v272_v1, %v268_v0  ;;  %v1564_v10 = vpack.c.bf16 %v274_v4, %v270_v2  ;;  %v314_v0 = vld [vmem:[#allocation5 + $0x7f0] sm:$0xff]  ;;  %v323_v4 = vld [vmem:[#allocation5 + $0x838] sm:$0xff] }
  0x8e   :  { %v1310_v11 = vpack.c.bf16 %v281_v6, %v277_v5  ;;  %v317_v1 = vld [vmem:[#allocation5 + $0x808] sm:$0xff]  ;;  %v355_v54 = vld [vmem:[#allocation5 + $0x938] sm:$0xff] }
  0x8f   :  { %1289 = vmatpush1.bf16.msra.mxu0 %v1288_v12  ;;  %v276_v12 = vld [vmem:[#allocation5 + $0x6c0] sm:$0xff]  ;;  %v321_v2 = vld [vmem:[#allocation5 + $0x828] sm:$0xff] }
  0x90   :  { %1545 = vmatpush1.bf16.msra.mxu1 %v1544_v14  ;;  %1291 = vmatprep.subr.bf16.mxu0 %v1290_v15  ;;  %v278_v14 = vld [vmem:[#allocation5 + $0x6d0] sm:$0xff]  ;;  %v1566_v15 = vpack.c.bf16 %v283_v8, %v279_v7  ;;  %v1312_v21 = vpack.c.bf16 %v280_v13, %v276_v12  ;;  %v1330_v7 = vpack.c.bf16 %v321_v2, %v317_v1  ;;  %v316_v8 = vld [vmem:[#allocation5 + $0x800] sm:$0xff]  ;;  %v325_v13 = vld [vmem:[#allocation5 + $0x848] sm:$0xff] }
  0x91   :  { %1547 = vmatprep.subr.bf16.mxu1 %v1546_v19  ;;  %v287_v19 = vld [vmem:[#allocation5 + $0x718] sm:$0xff]  ;;  %v1568_v22 = vpack.c.bf16 %v282_v16, %v278_v14  ;;  %v322_v12 = vld [vmem:[#allocation5 + $0x830] sm:$0xff]  ;;  %v329_v14 = vld [vmem:[#allocation5 + $0x868] sm:$0xff] }
  0x92   :  { %v331_v16 = vld [vmem:[#allocation5 + $0x878] sm:$0xff] }
  0x93   :  { %1293 = vmatpush1.bf16.msra.mxu0 %v1292_v25  ;;  %v288_v25 = vld [vmem:[#allocation5 + $0x720] sm:$0xff]  ;;  %v359_v1 = vld [vmem:[#allocation5 + $0x958] sm:$0xff] }
  0x94   :  { %1549 = vmatpush1.bf16.msra.mxu1 %v1548_v26  ;;  %1295 = vmatprep.subr.bf16.mxu0 %v1294_v27  ;;  %v286_v26 = vld [vmem:[#allocation5 + $0x710] sm:$0xff]  ;;  %v1570_v27 = vpack.c.bf16 %v291_v20, %v287_v19  ;;  %v1316_v33 = vpack.c.bf16 %v288_v25, %v284_v24  ;;  %v1334_v20 = vpack.c.bf16 %v329_v14, %v325_v13  ;;  %v363_v2 = vld [vmem:[#allocation5 + $0x978] sm:$0xff] }
  0x95   :  { %1551 = vmatprep.subr.bf16.mxu1 %v1550_v31  ;;  %v295_v31 = vld [vmem:[#allocation5 + $0x758] sm:$0xff]  ;;  %v1572_v34 = vpack.c.bf16 %v290_v28, %v286_v26  ;;  %v330_v25 = vld [vmem:[#allocation5 + $0x870] sm:$0xff]  ;;  %v333_v26 = vld [vmem:[#allocation5 + $0x888] sm:$0xff] }
  0x96   :  { %v335_v28 = vld [vmem:[#allocation5 + $0x898] sm:$0xff] }
  0x97   :  { %1297 = vmatpush1.bf16.msra.mxu0 %v1296_v37  ;;  %v296_v37 = vld [vmem:[#allocation5 + $0x760] sm:$0xff]  ;;  %v367_v13 = vld [vmem:[#allocation5 + $0x998] sm:$0xff] }
  0x98   :  { %1553 = vmatpush1.bf16.msra.mxu1 %v1552_v38  ;;  %1299 = vmatprep.subr.bf16.mxu0 %v1298_v39  ;;  %v294_v38 = vld [vmem:[#allocation5 + $0x750] sm:$0xff]  ;;  %v1574_v39 = vpack.c.bf16 %v299_v32, %v295_v31  ;;  %v1320_v45 = vpack.c.bf16 %v296_v37, %v292_v36  ;;  %v1594_v37 = vpack.c.bf16 %v339_v29, %v335_v28  ;;  %v371_v14 = vld [vmem:[#allocation5 + $0x9b8] sm:$0xff] }
  0x99   :  { %1555 = vmatprep.subr.bf16.mxu1 %v1554_v43  ;;  %v303_v43 = vld [vmem:[#allocation5 + $0x798] sm:$0xff]  ;;  %v1576_v46 = vpack.c.bf16 %v298_v40, %v294_v38  ;;  %v334_v36 = vld [vmem:[#allocation5 + $0x890] sm:$0xff]  ;;  %v345_v40 = vld [vmem:[#allocation5 + $0x8e8] sm:$0xff] }
  0x9a   :  { %v338_v38 = vld [vmem:[#allocation5 + $0x8b0] sm:$0xff] }
  0x9b   :  { %1301 = vmatpush1.bf16.msra.mxu0 %v1300_v49  ;;  %v304_v49 = vld [vmem:[#allocation5 + $0x7a0] sm:$0xff] }
  0x9c   :  { %1557 = vmatpush1.bf16.msra.mxu1 %v1556_v50  ;;  %1303 = vmatprep.subr.bf16.mxu0 %v1302_v51  ;;  %v302_v50 = vld [vmem:[#allocation5 + $0x790] sm:$0xff]  ;;  %v1578_v51 = vpack.c.bf16 %v307_v44, %v303_v43  ;;  %v1324_v57 = vpack.c.bf16 %v304_v49, %v300_v48  ;;  %v1596_v44 = vpack.c.bf16 %v338_v38, %v334_v36  ;;  %v385_v36 = vld [vmem:[#allocation5 + $0xa28] sm:$0xff]  ;;  %v387_v38 = vld [vmem:[#allocation5 + $0xa38] sm:$0xff] }
  0x9d   :  { %1559 = vmatprep.subr.bf16.mxu1 %v1558_v55  ;;  %v311_v55 = vld [vmem:[#allocation5 + $0x7d8] sm:$0xff]  ;;  %v1580_v58 = vpack.c.bf16 %v306_v52, %v302_v50  ;;  %v342_v48 = vld [vmem:[#allocation5 + $0x8d0] sm:$0xff]  ;;  %v1598_v49 = vpack.c.bf16 %v347_v42, %v343_v41  ;;  %v353_v52 = vld [vmem:[#allocation5 + $0x928] sm:$0xff] }
  0x9e   :  { %v346_v50 = vld [vmem:[#allocation5 + $0x8f0] sm:$0xff]  ;;  %v380_v42 = vld [vmem:[#allocation5 + $0xa00] sm:$0xff] }
  0x9f   :  { %1305 = vmatpush1.bf16.msra.mxu0 %v1304_v61  ;;  %v312_v61 = vld [vmem:[#allocation5 + $0x7e0] sm:$0xff] }
  0xa0   :  { %1561 = vmatpush1.bf16.msra.mxu1 %v1560_v62  ;;  %1307 = vmatprep.subr.bf16.mxu0 %v1306_v63  ;;  %v310_v62 = vld [vmem:[#allocation5 + $0x7d0] sm:$0xff]  ;;  %v1582_v63 = vpack.c.bf16 %v315_v56, %v311_v55  ;;  %v1328_v5 = vpack.c.bf16 %v312_v61, %v308_v60  ;;  %v1600_v56 = vpack.c.bf16 %v346_v50, %v342_v48  ;;  %v393_v48 = vld [vmem:[#allocation5 + $0xa68] sm:$0xff]  ;;  %v395_v50 = vld [vmem:[#allocation5 + $0xa78] sm:$0xff] }
  0xa1   :  { %1563 = vmatprep.subr.bf16.mxu1 %v1562_v3  ;;  %v319_v3 = vld [vmem:[#allocation5 + $0x818] sm:$0xff]  ;;  %v1584_v6 = vpack.c.bf16 %v314_v0, %v310_v62  ;;  %v350_v60 = vld [vmem:[#allocation5 + $0x910] sm:$0xff]  ;;  %v1602_v61 = vpack.c.bf16 %v355_v54, %v351_v53  ;;  %v361_v0 = vld [vmem:[#allocation5 + $0x968] sm:$0xff] }
  0xa2   :  { %v354_v62 = vld [vmem:[#allocation5 + $0x930] sm:$0xff]  ;;  %v388_v54 = vld [vmem:[#allocation5 + $0xa40] sm:$0xff] }
  0xa3   :  { %1309 = vmatpush1.bf16.msra.mxu0 %v1308_v9  ;;  %v320_v9 = vld [vmem:[#allocation5 + $0x820] sm:$0xff] }
  0xa4   :  { %1565 = vmatpush1.bf16.msra.mxu1 %v1564_v10  ;;  %1311 = vmatprep.subr.bf16.mxu0 %v1310_v11  ;;  %v318_v10 = vld [vmem:[#allocation5 + $0x810] sm:$0xff]  ;;  %v1586_v11 = vpack.c.bf16 %v323_v4, %v319_v3  ;;  %v1332_v18 = vpack.c.bf16 %v320_v9, %v316_v8  ;;  %v1604_v4 = vpack.c.bf16 %v354_v62, %v350_v60  ;;  %v401_v60 = vld [vmem:[#allocation5 + $0xaa8] sm:$0xff]  ;;  %v403_v62 = vld [vmem:[#allocation5 + $0xab8] sm:$0xff] }
  0xa5   :  { %1567 = vmatprep.subr.bf16.mxu1 %v1566_v15  ;;  %v327_v15 = vld [vmem:[#allocation5 + $0x858] sm:$0xff]  ;;  %v1588_v19 = vpack.c.bf16 %v322_v12, %v318_v10  ;;  %v358_v8 = vld [vmem:[#allocation5 + $0x950] sm:$0xff]  ;;  %v1606_v9 = vpack.c.bf16 %v363_v2, %v359_v1  ;;  %v369_v12 = vld [vmem:[#allocation5 + $0x9a8] sm:$0xff] }
  0xa6   :  { %v1590_v24 = vpack.c.bf16 %v331_v16, %v327_v15  ;;  %v362_v10 = vld [vmem:[#allocation5 + $0x970] sm:$0xff]  ;;  %v396_v2 = vld [vmem:[#allocation5 + $0xa80] sm:$0xff] }
  0xa7   :  { %1313 = vmatpush1.bf16.msra.mxu0 %v1312_v21  ;;  %v324_v21 = vld [vmem:[#allocation5 + $0x840] sm:$0xff]  ;;  %v1608_v16 = vpack.c.bf16 %v362_v10, %v358_v8  ;;  %v409_v8 = vld [vmem:[#allocation5 + $0xae8] sm:$0xff]  ;;  %v411_v10 = vld [vmem:[#allocation5 + $0xaf8] sm:$0xff] }
  0xa8   :  { %1569 = vmatpush1.bf16.msra.mxu1 %v1568_v22  ;;  %1315 = vmatprep.subr.bf16.mxu0 %v1314_v23  ;;  %v328_v22 = vld [vmem:[#allocation5 + $0x860] sm:$0xff]  ;;  %v326_v23 = vld [vmem:[#allocation5 + $0x850] sm:$0xff] }
  0xa9   :  { %1571 = vmatprep.subr.bf16.mxu1 %v1570_v27  ;;  %v337_v27 = vld [vmem:[#allocation5 + $0x8a8] sm:$0xff]  ;;  %v1336_v31 = vpack.c.bf16 %v328_v22, %v324_v21  ;;  %v1592_v32 = vpack.c.bf16 %v330_v25, %v326_v23  ;;  %v1610_v21 = vpack.c.bf16 %v371_v14, %v367_v13  ;;  %v370_v22 = vld [vmem:[#allocation5 + $0x9b0] sm:$0xff]  ;;  %v375_v25 = vld [vmem:[#allocation5 + $0x9d8] sm:$0xff] }
  0xaa   :  { %v373_v23 = vld [vmem:[#allocation5 + $0x9c8] sm:$0xff]  ;;  %v404_v14 = vld [vmem:[#allocation5 + $0xac0] sm:$0xff] }
  0xab   :  { %1317 = vmatpush1.bf16.msra.mxu0 %v1316_v33  ;;  %v1338_v33 = vpack.c.bf16 %v337_v27, %v333_v26  ;;  %v379_v26 = vld [vmem:[#allocation5 + $0x9f8] sm:$0xff] }
  0xac   :  { %1573 = vmatpush1.bf16.msra.mxu1 %v1572_v34  ;;  %1319 = vmatprep.subr.bf16.mxu0 %v1318_v35  ;;  %v332_v34 = vld [vmem:[#allocation5 + $0x880] sm:$0xff] }
  0xad   :  { %1575 = vmatprep.subr.bf16.mxu1 %v1574_v39  ;;  %v336_v35 = vld [vmem:[#allocation5 + $0x8a0] sm:$0xff]  ;;  %v341_v39 = vld [vmem:[#allocation5 + $0x8c8] sm:$0xff] }
  0xae   :  { %v1340_v43 = vpack.c.bf16 %v336_v35, %v332_v34  ;;  %v378_v34 = vld [vmem:[#allocation5 + $0x9f0] sm:$0xff]  ;;  %v381_v35 = vld [vmem:[#allocation5 + $0xa08] sm:$0xff] }
  0xaf   :  { %1321 = vmatpush1.bf16.msra.mxu0 %v1320_v45  ;;  %v1342_v45 = vpack.c.bf16 %v345_v40, %v341_v39  ;;  %v1362_v41 = vpack.c.bf16 %v385_v36, %v381_v35 }
  0xb0   :  { %1577 = vmatpush1.bf16.msra.mxu1 %v1576_v46  ;;  %1323 = vmatprep.subr.bf16.mxu0 %v1322_v47  ;;  %v340_v46 = vld [vmem:[#allocation5 + $0x8c0] sm:$0xff] }
  0xb1   :  { %1579 = vmatprep.subr.bf16.mxu1 %v1578_v51  ;;  %v344_v47 = vld [vmem:[#allocation5 + $0x8e0] sm:$0xff]  ;;  %v349_v51 = vld [vmem:[#allocation5 + $0x908] sm:$0xff] }
  0xb2   :  { %v1344_v55 = vpack.c.bf16 %v344_v47, %v340_v46  ;;  %v386_v46 = vld [vmem:[#allocation5 + $0xa30] sm:$0xff]  ;;  %v389_v47 = vld [vmem:[#allocation5 + $0xa48] sm:$0xff] }
  0xb3   :  { %1325 = vmatpush1.bf16.msra.mxu0 %v1324_v57  ;;  %v1346_v57 = vpack.c.bf16 %v353_v52, %v349_v51  ;;  %v1366_v53 = vpack.c.bf16 %v393_v48, %v389_v47 }
  0xb4   :  { %1581 = vmatpush1.bf16.msra.mxu1 %v1580_v58  ;;  %1327 = vmatprep.subr.bf16.mxu0 %v1326_v59  ;;  %v348_v58 = vld [vmem:[#allocation5 + $0x900] sm:$0xff] }
  0xb5   :  { %1583 = vmatprep.subr.bf16.mxu1 %v1582_v63  ;;  %v352_v59 = vld [vmem:[#allocation5 + $0x920] sm:$0xff]  ;;  %v357_v63 = vld [vmem:[#allocation5 + $0x948] sm:$0xff] }
  0xb6   :  { %v1348_v3 = vpack.c.bf16 %v352_v59, %v348_v58  ;;  %v394_v58 = vld [vmem:[#allocation5 + $0xa70] sm:$0xff]  ;;  %v397_v59 = vld [vmem:[#allocation5 + $0xa88] sm:$0xff] }
  0xb7   :  { %1329 = vmatpush1.bf16.msra.mxu0 %v1328_v5  ;;  %v1350_v5 = vpack.c.bf16 %v361_v0, %v357_v63  ;;  %v1370_v1 = vpack.c.bf16 %v401_v60, %v397_v59 }
  0xb8   :  { %1585 = vmatpush1.bf16.msra.mxu1 %v1584_v6  ;;  %1331 = vmatprep.subr.bf16.mxu0 %v1330_v7  ;;  %v356_v6 = vld [vmem:[#allocation5 + $0x940] sm:$0xff] }
  0xb9   :  { %1587 = vmatprep.subr.bf16.mxu1 %v1586_v11  ;;  %v360_v7 = vld [vmem:[#allocation5 + $0x960] sm:$0xff]  ;;  %v365_v11 = vld [vmem:[#allocation5 + $0x988] sm:$0xff] }
  0xba   :  { %730 = vmatmul.mubr.f32.vlgmr.msra.gmra.mrb[0].mxu0 %v54_v17  ;;  %v1352_v15 = vpack.c.bf16 %v360_v7, %v356_v6  ;;  %v402_v6 = vld [vmem:[#allocation5 + $0xab0] sm:$0xff]  ;;  %v405_v7 = vld [vmem:[#allocation5 + $0xac8] sm:$0xff] }
  0xbb   :  { %1333 = vmatpush1.bf16.msra.mxu0 %v1332_v18  ;;  %1014 = vmatmul.mubr.f32.vlgmr.msra.gmra.mrb[0].mxu1 %v54_v17  ;;  %v1354_v17 = vpack.c.bf16 %v369_v12, %v365_v11  ;;  %v364_v18 = vld [vmem:[#allocation5 + $0x980] sm:$0xff]  ;;  %v1374_v13 = vpack.c.bf16 %v409_v8, %v405_v7 }
  0xbc   :  { %1589 = vmatpush1.bf16.msra.mxu1 %v1588_v19  ;;  %1335 = vmatprep.subr.bf16.mxu0 %v1334_v20  ;;  %v368_v19 = vld [vmem:[#allocation5 + $0x9a0] sm:$0xff]  ;;  %v366_v20 = vld [vmem:[#allocation5 + $0x990] sm:$0xff] }
  0xbd   :  { %1591 = vmatprep.subr.bf16.mxu1 %v1590_v24  ;;  %800 = vmatprep.mubr.f32.mxu0 %v57_v30  ;;  %v377_v24 = vld [vmem:[#allocation5 + $0x9e8] sm:$0xff]  ;;  %v1356_v27 = vpack.c.bf16 %v368_v19, %v364_v18  ;;  %v1612_v28 = vpack.c.bf16 %v370_v22, %v366_v20  ;;  %v410_v18 = vld [vmem:[#allocation5 + $0xaf0] sm:$0xff]  ;;  %v419_v22 = vld [vmem:[#allocation5 + $0xb38] sm:$0xff] }
  0xbe   :  { %1084 = vmatprep.mubr.f32.mxu1 %v57_v30  ;;  %v1358_v29 = vpack.c.bf16 %v377_v24, %v373_v23  ;;  %v372_v30 = vld [vmem:[#allocation5 + $0x9c0] sm:$0xff]  ;;  %v413_v19 = vld [vmem:[#allocation5 + $0xb08] sm:$0xff] }
  0xbf   :  { %1337 = vmatpush1.bf16.msra.mxu0 %v1336_v31  ;;  %v376_v31 = vld [vmem:[#allocation5 + $0x9e0] sm:$0xff]  ;;  %v417_v20 = vld [vmem:[#allocation5 + $0xb28] sm:$0xff] }
  0xc0   :  { %1593 = vmatpush1.bf16.msra.mxu1 %v1592_v32  ;;  %1339 = vmatprep.subr.bf16.mxu0 %v1338_v33  ;;  %v374_v32 = vld [vmem:[#allocation5 + $0x9d0] sm:$0xff]  ;;  %v1614_v33 = vpack.c.bf16 %v379_v26, %v375_v25  ;;  %v1360_v39 = vpack.c.bf16 %v376_v31, %v372_v30  ;;  %v1378_v25 = vpack.c.bf16 %v417_v20, %v413_v19  ;;  %v412_v26 = vld [vmem:[#allocation5 + $0xb00] sm:$0xff]  ;;  %v421_v31 = vld [vmem:[#allocation5 + $0xb48] sm:$0xff] }
  0xc1   :  { %1595 = vmatprep.subr.bf16.mxu1 %v1594_v37  ;;  %v383_v37 = vld [vmem:[#allocation5 + $0xa18] sm:$0xff]  ;;  %v1616_v40 = vpack.c.bf16 %v378_v34, %v374_v32  ;;  %v418_v30 = vld [vmem:[#allocation5 + $0xb30] sm:$0xff]  ;;  %v425_v32 = vld [vmem:[#allocation5 + $0xb68] sm:$0xff] }
  0xc2   :  { %v427_v34 = vld [vmem:[#allocation5 + $0xb78] sm:$0xff]  ;;  %v56_v19 = vld [vmem:[#allocation2 + $0x20] sm:$0xff] }
  0xc3   :  { %1341 = vmatpush1.bf16.msra.mxu0 %v1340_v43  ;;  %v384_v43 = vld [vmem:[#allocation5 + $0xa20] sm:$0xff] }
  0xc4   :  { %1597 = vmatpush1.bf16.msra.mxu1 %v1596_v44  ;;  %1343 = vmatprep.subr.bf16.mxu0 %v1342_v45  ;;  %v382_v44 = vld [vmem:[#allocation5 + $0xa10] sm:$0xff]  ;;  %v1618_v45 = vpack.c.bf16 %v387_v38, %v383_v37  ;;  %v1364_v51 = vpack.c.bf16 %v384_v43, %v380_v42  ;;  %v1382_v37 = vpack.c.bf16 %v425_v32, %v421_v31  ;;  %v420_v38 = vld [vmem:[#allocation5 + $0xb40] sm:$0xff]  ;;  %v429_v43 = vld [vmem:[#allocation5 + $0xb88] sm:$0xff] }
  0xc5   :  { %1599 = vmatprep.subr.bf16.mxu1 %v1598_v49  ;;  %v391_v49 = vld [vmem:[#allocation5 + $0xa58] sm:$0xff]  ;;  %v1620_v52 = vpack.c.bf16 %v386_v46, %v382_v44  ;;  %v426_v42 = vld [vmem:[#allocation5 + $0xb70] sm:$0xff]  ;;  %v433_v44 = vld [vmem:[#allocation5 + $0xba8] sm:$0xff] }
  0xc6   :  { %v435_v46 = vld [vmem:[#allocation5 + $0xbb8] sm:$0xff] }
  0xc7   :  { %1345 = vmatpush1.bf16.msra.mxu0 %v1344_v55  ;;  %v392_v55 = vld [vmem:[#allocation5 + $0xa60] sm:$0xff]  ;;  %v467_v31 = vld [vmem:[#allocation5 + $0xcb8] sm:$0xff] }
  0xc8   :  { %1601 = vmatpush1.bf16.msra.mxu1 %v1600_v56  ;;  %1347 = vmatprep.subr.bf16.mxu0 %v1346_v57  ;;  %v390_v56 = vld [vmem:[#allocation5 + $0xa50] sm:$0xff]  ;;  %v1622_v57 = vpack.c.bf16 %v395_v50, %v391_v49  ;;  %v1368_v63 = vpack.c.bf16 %v392_v55, %v388_v54  ;;  %v1386_v49 = vpack.c.bf16 %v433_v44, %v429_v43  ;;  %v428_v50 = vld [vmem:[#allocation5 + $0xb80] sm:$0xff]  ;;  %v437_v55 = vld [vmem:[#allocation5 + $0xbc8] sm:$0xff] }
  0xc9   :  { %1603 = vmatprep.subr.bf16.mxu1 %v1602_v61  ;;  %v399_v61 = vld [vmem:[#allocation5 + $0xa98] sm:$0xff]  ;;  %v1624_v0 = vpack.c.bf16 %v394_v58, %v390_v56  ;;  %v434_v54 = vld [vmem:[#allocation5 + $0xbb0] sm:$0xff]  ;;  %v441_v56 = vld [vmem:[#allocation5 + $0xbe8] sm:$0xff] }
  0xca   :  { %v443_v58 = vld [vmem:[#allocation5 + $0xbf8] sm:$0xff] }
  0xcb   :  { %1349 = vmatpush1.bf16.msra.mxu0 %v1348_v3  ;;  %v400_v3 = vld [vmem:[#allocation5 + $0xaa0] sm:$0xff]  ;;  %v59_v32 = vld [vmem:[#allocation2 + $0x38] sm:$0xff] }
  0xcc   :  { %1605 = vmatpush1.bf16.msra.mxu1 %v1604_v4  ;;  %1351 = vmatprep.subr.bf16.mxu0 %v1350_v5  ;;  %v398_v4 = vld [vmem:[#allocation5 + $0xa90] sm:$0xff]  ;;  %v1626_v5 = vpack.c.bf16 %v403_v62, %v399_v61  ;;  %v1372_v11 = vpack.c.bf16 %v400_v3, %v396_v2  ;;  %v1390_v61 = vpack.c.bf16 %v441_v56, %v437_v55  ;;  %v436_v62 = vld [vmem:[#allocation5 + $0xbc0] sm:$0xff]  ;;  %v445_v3 = vld [vmem:[#allocation5 + $0xc08] sm:$0xff] }
  0xcd   :  { %1607 = vmatprep.subr.bf16.mxu1 %v1606_v9  ;;  %v407_v9 = vld [vmem:[#allocation5 + $0xad8] sm:$0xff]  ;;  %v1628_v12 = vpack.c.bf16 %v402_v6, %v398_v4  ;;  %v442_v2 = vld [vmem:[#allocation5 + $0xbf0] sm:$0xff]  ;;  %v449_v4 = vld [vmem:[#allocation5 + $0xc28] sm:$0xff] }
  0xce   :  { %v451_v6 = vld [vmem:[#allocation5 + $0xc38] sm:$0xff] }
  0xcf   :  { %1353 = vmatpush1.bf16.msra.mxu0 %v1352_v15  ;;  %v408_v15 = vld [vmem:[#allocation5 + $0xae0] sm:$0xff]  ;;  %v471_v43 = vld [vmem:[#allocation5 + $0xcd8] sm:$0xff] }
  0xd0   :  { %1609 = vmatpush1.bf16.msra.mxu1 %v1608_v16  ;;  %1355 = vmatprep.subr.bf16.mxu0 %v1354_v17  ;;  %v406_v16 = vld [vmem:[#allocation5 + $0xad0] sm:$0xff]  ;;  %v1630_v17 = vpack.c.bf16 %v411_v10, %v407_v9  ;;  %v1376_v23 = vpack.c.bf16 %v408_v15, %v404_v14  ;;  %v1394_v9 = vpack.c.bf16 %v449_v4, %v445_v3  ;;  %v444_v10 = vld [vmem:[#allocation5 + $0xc00] sm:$0xff]  ;;  %v453_v15 = vld [vmem:[#allocation5 + $0xc48] sm:$0xff] }
  0xd1   :  { %1611 = vmatprep.subr.bf16.mxu1 %v1610_v21  ;;  %v415_v21 = vld [vmem:[#allocation5 + $0xb18] sm:$0xff]  ;;  %v1632_v24 = vpack.c.bf16 %v410_v18, %v406_v16  ;;  %v450_v14 = vld [vmem:[#allocation5 + $0xc30] sm:$0xff]  ;;  %v457_v16 = vld [vmem:[#allocation5 + $0xc68] sm:$0xff] }
  0xd2   :  { %v459_v18 = vld [vmem:[#allocation5 + $0xc78] sm:$0xff] }
  0xd3   :  { %1357 = vmatpush1.bf16.msra.mxu0 %v1356_v27  ;;  %v416_v27 = vld [vmem:[#allocation5 + $0xb20] sm:$0xff]  ;;  %v475_v44 = vld [vmem:[#allocation5 + $0xcf8] sm:$0xff] }
  0xd4   :  { %1613 = vmatpush1.bf16.msra.mxu1 %v1612_v28  ;;  %1359 = vmatprep.subr.bf16.mxu0 %v1358_v29  ;;  %v414_v28 = vld [vmem:[#allocation5 + $0xb10] sm:$0xff]  ;;  %v1634_v29 = vpack.c.bf16 %v419_v22, %v415_v21  ;;  %v1380_v35 = vpack.c.bf16 %v416_v27, %v412_v26  ;;  %v1398_v22 = vpack.c.bf16 %v457_v16, %v453_v15  ;;  %v479_v55 = vld [vmem:[#allocation5 + $0xd18] sm:$0xff] }
  0xd5   :  { %1615 = vmatprep.subr.bf16.mxu1 %v1614_v33  ;;  %v423_v33 = vld [vmem:[#allocation5 + $0xb58] sm:$0xff]  ;;  %v1636_v36 = vpack.c.bf16 %v418_v30, %v414_v28  ;;  %v458_v27 = vld [vmem:[#allocation5 + $0xc70] sm:$0xff]  ;;  %v461_v28 = vld [vmem:[#allocation5 + $0xc88] sm:$0xff] }
  0xd6   :  { %v463_v30 = vld [vmem:[#allocation5 + $0xc98] sm:$0xff] }
  0xd7   :  { %1361 = vmatpush1.bf16.msra.mxu0 %v1360_v39  ;;  %v424_v39 = vld [vmem:[#allocation5 + $0xb60] sm:$0xff]  ;;  %v483_v56 = vld [vmem:[#allocation5 + $0xd38] sm:$0xff] }
  0xd8   :  { %1617 = vmatpush1.bf16.msra.mxu1 %v1616_v40  ;;  %1363 = vmatprep.subr.bf16.mxu0 %v1362_v41  ;;  %v422_v40 = vld [vmem:[#allocation5 + $0xb50] sm:$0xff]  ;;  %v1638_v41 = vpack.c.bf16 %v427_v34, %v423_v33  ;;  %v1384_v47 = vpack.c.bf16 %v424_v39, %v420_v38  ;;  %v1658_v39 = vpack.c.bf16 %v467_v31, %v463_v30  ;;  %v487_v3 = vld [vmem:[#allocation5 + $0xd58] sm:$0xff] }
  0xd9   :  { %1619 = vmatprep.subr.bf16.mxu1 %v1618_v45  ;;  %v431_v45 = vld [vmem:[#allocation5 + $0xb98] sm:$0xff]  ;;  %v1640_v48 = vpack.c.bf16 %v426_v42, %v422_v40  ;;  %v462_v38 = vld [vmem:[#allocation5 + $0xc90] sm:$0xff]  ;;  %v473_v42 = vld [vmem:[#allocation5 + $0xce8] sm:$0xff] }
  0xda   :  { %v466_v40 = vld [vmem:[#allocation5 + $0xcb0] sm:$0xff]  ;;  %v491_v4 = vld [vmem:[#allocation5 + $0xd78] sm:$0xff] }
  0xdb   :  { %1365 = vmatpush1.bf16.msra.mxu0 %v1364_v51  ;;  %v432_v51 = vld [vmem:[#allocation5 + $0xba0] sm:$0xff]  ;;  %v495_v15 = vld [vmem:[#allocation5 + $0xd98] sm:$0xff] }
  0xdc   :  { %1621 = vmatpush1.bf16.msra.mxu1 %v1620_v52  ;;  %1367 = vmatprep.subr.bf16.mxu0 %v1366_v53  ;;  %v430_v52 = vld [vmem:[#allocation5 + $0xb90] sm:$0xff]  ;;  %v1642_v53 = vpack.c.bf16 %v435_v46, %v431_v45  ;;  %v1388_v59 = vpack.c.bf16 %v432_v51, %v428_v50  ;;  %v1660_v46 = vpack.c.bf16 %v466_v40, %v462_v38  ;;  %v499_v16 = vld [vmem:[#allocation5 + $0xdb8] sm:$0xff]  ;;  %v513_v38 = vld [vmem:[#allocation5 + $0xe28] sm:$0xff] }
  0xdd   :  { %1623 = vmatprep.subr.bf16.mxu1 %v1622_v57  ;;  %v439_v57 = vld [vmem:[#allocation5 + $0xbd8] sm:$0xff]  ;;  %v1644_v60 = vpack.c.bf16 %v434_v54, %v430_v52  ;;  %v470_v50 = vld [vmem:[#allocation5 + $0xcd0] sm:$0xff]  ;;  %v1662_v51 = vpack.c.bf16 %v475_v44, %v471_v43  ;;  %v481_v54 = vld [vmem:[#allocation5 + $0xd28] sm:$0xff] }
  0xde   :  { %v474_v52 = vld [vmem:[#allocation5 + $0xcf0] sm:$0xff]  ;;  %v515_v40 = vld [vmem:[#allocation5 + $0xe38] sm:$0xff]  ;;  %v508_v44 = vld [vmem:[#allocation5 + $0xe00] sm:$0xff] }
  0xdf   :  { %1369 = vmatpush1.bf16.msra.mxu0 %v1368_v63  ;;  %v440_v63 = vld [vmem:[#allocation5 + $0xbe0] sm:$0xff] }
  0xe0   :  { %1625 = vmatpush1.bf16.msra.mxu1 %v1624_v0  ;;  %1371 = vmatprep.subr.bf16.mxu0 %v1370_v1  ;;  %v438_v0 = vld [vmem:[#allocation5 + $0xbd0] sm:$0xff]  ;;  %v1646_v1 = vpack.c.bf16 %v443_v58, %v439_v57  ;;  %v1392_v7 = vpack.c.bf16 %v440_v63, %v436_v62  ;;  %v1664_v58 = vpack.c.bf16 %v474_v52, %v470_v50  ;;  %v521_v50 = vld [vmem:[#allocation5 + $0xe68] sm:$0xff]  ;;  %v523_v52 = vld [vmem:[#allocation5 + $0xe78] sm:$0xff] }
  0xe1   :  { %1627 = vmatprep.subr.bf16.mxu1 %v1626_v5  ;;  %v447_v5 = vld [vmem:[#allocation5 + $0xc18] sm:$0xff]  ;;  %v1648_v8 = vpack.c.bf16 %v442_v2, %v438_v0  ;;  %v478_v62 = vld [vmem:[#allocation5 + $0xd10] sm:$0xff]  ;;  %v1666_v63 = vpack.c.bf16 %v483_v56, %v479_v55  ;;  %v489_v2 = vld [vmem:[#allocation5 + $0xd68] sm:$0xff] }
  0xe2   :  { %v482_v0 = vld [vmem:[#allocation5 + $0xd30] sm:$0xff]  ;;  %v516_v56 = vld [vmem:[#allocation5 + $0xe40] sm:$0xff] }
  0xe3   :  { %1373 = vmatpush1.bf16.msra.mxu0 %v1372_v11  ;;  %v448_v11 = vld [vmem:[#allocation5 + $0xc20] sm:$0xff] }
  0xe4   :  { %1629 = vmatpush1.bf16.msra.mxu1 %v1628_v12  ;;  %1375 = vmatprep.subr.bf16.mxu0 %v1374_v13  ;;  %v446_v12 = vld [vmem:[#allocation5 + $0xc10] sm:$0xff]  ;;  %v1650_v13 = vpack.c.bf16 %v451_v6, %v447_v5  ;;  %v1396_v20 = vpack.c.bf16 %v448_v11, %v444_v10  ;;  %v1668_v6 = vpack.c.bf16 %v482_v0, %v478_v62  ;;  %v529_v62 = vld [vmem:[#allocation5 + $0xea8] sm:$0xff]  ;;  %v531_v0 = vld [vmem:[#allocation5 + $0xeb8] sm:$0xff] }
  0xe5   :  { %1631 = vmatprep.subr.bf16.mxu1 %v1630_v17  ;;  %v455_v17 = vld [vmem:[#allocation5 + $0xc58] sm:$0xff]  ;;  %v1652_v21 = vpack.c.bf16 %v450_v14, %v446_v12  ;;  %v486_v10 = vld [vmem:[#allocation5 + $0xd50] sm:$0xff]  ;;  %v1670_v11 = vpack.c.bf16 %v491_v4, %v487_v3  ;;  %v497_v14 = vld [vmem:[#allocation5 + $0xda8] sm:$0xff] }
  0xe6   :  { %v1654_v26 = vpack.c.bf16 %v459_v18, %v455_v17  ;;  %v490_v12 = vld [vmem:[#allocation5 + $0xd70] sm:$0xff]  ;;  %v524_v4 = vld [vmem:[#allocation5 + $0xe80] sm:$0xff] }
  0xe7   :  { %1377 = vmatpush1.bf16.msra.mxu0 %v1376_v23  ;;  %v452_v23 = vld [vmem:[#allocation5 + $0xc40] sm:$0xff]  ;;  %v1672_v18 = vpack.c.bf16 %v490_v12, %v486_v10  ;;  %v537_v10 = vld [vmem:[#allocation5 + $0xee8] sm:$0xff]  ;;  %v539_v12 = vld [vmem:[#allocation5 + $0xef8] sm:$0xff] }
  0xe8   :  { %1633 = vmatpush1.bf16.msra.mxu1 %v1632_v24  ;;  %1379 = vmatprep.subr.bf16.mxu0 %v1378_v25  ;;  %v456_v24 = vld [vmem:[#allocation5 + $0xc60] sm:$0xff]  ;;  %v454_v25 = vld [vmem:[#allocation5 + $0xc50] sm:$0xff] }
  0xe9   :  { %1635 = vmatprep.subr.bf16.mxu1 %v1634_v29  ;;  %v465_v29 = vld [vmem:[#allocation5 + $0xca8] sm:$0xff]  ;;  %v1400_v33 = vpack.c.bf16 %v456_v24, %v452_v23  ;;  %v1656_v34 = vpack.c.bf16 %v458_v27, %v454_v25  ;;  %v1674_v23 = vpack.c.bf16 %v499_v16, %v495_v15  ;;  %v498_v24 = vld [vmem:[#allocation5 + $0xdb0] sm:$0xff]  ;;  %v503_v27 = vld [vmem:[#allocation5 + $0xdd8] sm:$0xff] }
  0xea   :  { %v501_v25 = vld [vmem:[#allocation5 + $0xdc8] sm:$0xff]  ;;  %v532_v16 = vld [vmem:[#allocation5 + $0xec0] sm:$0xff] }
  0xeb   :  { %1381 = vmatpush1.bf16.msra.mxu0 %v1380_v35  ;;  %v1402_v35 = vpack.c.bf16 %v465_v29, %v461_v28  ;;  %v507_v28 = vld [vmem:[#allocation5 + $0xdf8] sm:$0xff] }
  0xec   :  { %1637 = vmatpush1.bf16.msra.mxu1 %v1636_v36  ;;  %1383 = vmatprep.subr.bf16.mxu0 %v1382_v37  ;;  %v460_v36 = vld [vmem:[#allocation5 + $0xc80] sm:$0xff] }
  0xed   :  { %1639 = vmatprep.subr.bf16.mxu1 %v1638_v41  ;;  %v464_v37 = vld [vmem:[#allocation5 + $0xca0] sm:$0xff]  ;;  %v469_v41 = vld [vmem:[#allocation5 + $0xcc8] sm:$0xff] }
  0xee   :  { %v1404_v45 = vpack.c.bf16 %v464_v37, %v460_v36  ;;  %v506_v36 = vld [vmem:[#allocation5 + $0xdf0] sm:$0xff]  ;;  %v509_v37 = vld [vmem:[#allocation5 + $0xe08] sm:$0xff] }
  0xef   :  { %1385 = vmatpush1.bf16.msra.mxu0 %v1384_v47  ;;  %v1406_v47 = vpack.c.bf16 %v473_v42, %v469_v41  ;;  %v1426_v43 = vpack.c.bf16 %v513_v38, %v509_v37 }
  0xf0   :  { %1641 = vmatpush1.bf16.msra.mxu1 %v1640_v48  ;;  %1387 = vmatprep.subr.bf16.mxu0 %v1386_v49  ;;  %v468_v48 = vld [vmem:[#allocation5 + $0xcc0] sm:$0xff] }
  0xf1   :  { %1643 = vmatprep.subr.bf16.mxu1 %v1642_v53  ;;  %v472_v49 = vld [vmem:[#allocation5 + $0xce0] sm:$0xff]  ;;  %v477_v53 = vld [vmem:[#allocation5 + $0xd08] sm:$0xff] }
  0xf2   :  { %v1408_v57 = vpack.c.bf16 %v472_v49, %v468_v48  ;;  %v514_v48 = vld [vmem:[#allocation5 + $0xe30] sm:$0xff]  ;;  %v517_v49 = vld [vmem:[#allocation5 + $0xe48] sm:$0xff] }
  0xf3   :  { %1389 = vmatpush1.bf16.msra.mxu0 %v1388_v59  ;;  %v1410_v59 = vpack.c.bf16 %v481_v54, %v477_v53  ;;  %v1430_v55 = vpack.c.bf16 %v521_v50, %v517_v49 }
  0xf4   :  { %1645 = vmatpush1.bf16.msra.mxu1 %v1644_v60  ;;  %1391 = vmatprep.subr.bf16.mxu0 %v1390_v61  ;;  %v476_v60 = vld [vmem:[#allocation5 + $0xd00] sm:$0xff] }
  0xf5   :  { %1647 = vmatprep.subr.bf16.mxu1 %v1646_v1  ;;  %v480_v61 = vld [vmem:[#allocation5 + $0xd20] sm:$0xff]  ;;  %v485_v1 = vld [vmem:[#allocation5 + $0xd48] sm:$0xff] }
  0xf6   :  { %v1412_v5 = vpack.c.bf16 %v480_v61, %v476_v60  ;;  %v522_v60 = vld [vmem:[#allocation5 + $0xe70] sm:$0xff]  ;;  %v525_v61 = vld [vmem:[#allocation5 + $0xe88] sm:$0xff] }
  0xf7   :  { %1393 = vmatpush1.bf16.msra.mxu0 %v1392_v7  ;;  %v1414_v7 = vpack.c.bf16 %v489_v2, %v485_v1  ;;  %v1434_v3 = vpack.c.bf16 %v529_v62, %v525_v61 }
  0xf8   :  { %1649 = vmatpush1.bf16.msra.mxu1 %v1648_v8  ;;  %1395 = vmatprep.subr.bf16.mxu0 %v1394_v9  ;;  %v484_v8 = vld [vmem:[#allocation5 + $0xd40] sm:$0xff] }
  0xf9   :  { %1651 = vmatprep.subr.bf16.mxu1 %v1650_v13  ;;  %v488_v9 = vld [vmem:[#allocation5 + $0xd60] sm:$0xff]  ;;  %v493_v13 = vld [vmem:[#allocation5 + $0xd88] sm:$0xff] }
  0xfa   :  { %801 = vmatmul.mubr.f32.vlgmr.msra.gmra.mrb[0].mxu0 %v56_v19  ;;  %v1416_v17 = vpack.c.bf16 %v488_v9, %v484_v8  ;;  %v530_v8 = vld [vmem:[#allocation5 + $0xeb0] sm:$0xff]  ;;  %v533_v9 = vld [vmem:[#allocation5 + $0xec8] sm:$0xff] }
  0xfb   :  { %1397 = vmatpush1.bf16.msra.mxu0 %v1396_v20  ;;  %1085 = vmatmul.mubr.f32.vlgmr.msra.gmra.mrb[0].mxu1 %v56_v19  ;;  %v1418_v19 = vpack.c.bf16 %v497_v14, %v493_v13  ;;  %v492_v20 = vld [vmem:[#allocation5 + $0xd80] sm:$0xff]  ;;  %v1438_v15 = vpack.c.bf16 %v537_v10, %v533_v9 }
  0xfc   :  { %1653 = vmatpush1.bf16.msra.mxu1 %v1652_v21  ;;  %1399 = vmatprep.subr.bf16.mxu0 %v1398_v22  ;;  %v496_v21 = vld [vmem:[#allocation5 + $0xda0] sm:$0xff]  ;;  %v494_v22 = vld [vmem:[#allocation5 + $0xd90] sm:$0xff] }
  0xfd   :  { %1655 = vmatprep.subr.bf16.mxu1 %v1654_v26  ;;  %871 = vmatprep.mubr.f32.mxu0 %v59_v32  ;;  %v505_v26 = vld [vmem:[#allocation5 + $0xde8] sm:$0xff]  ;;  %v1420_v29 = vpack.c.bf16 %v496_v21, %v492_v20  ;;  %v1676_v30 = vpack.c.bf16 %v498_v24, %v494_v22  ;;  %v538_v20 = vld [vmem:[#allocation5 + $0xef0] sm:$0xff]  ;;  %v547_v24 = vld [vmem:[#allocation5 + $0xf38] sm:$0xff] }
  0xfe   :  { %1155 = vmatprep.mubr.f32.mxu1 %v59_v32  ;;  %v1422_v31 = vpack.c.bf16 %v505_v26, %v501_v25  ;;  %v500_v32 = vld [vmem:[#allocation5 + $0xdc0] sm:$0xff]  ;;  %v541_v21 = vld [vmem:[#allocation5 + $0xf08] sm:$0xff] }
  0xff   :  { %1401 = vmatpush1.bf16.msra.mxu0 %v1400_v33  ;;  %v504_v33 = vld [vmem:[#allocation5 + $0xde0] sm:$0xff]  ;;  %v545_v22 = vld [vmem:[#allocation5 + $0xf28] sm:$0xff] }
 0x100   :  { %1657 = vmatpush1.bf16.msra.mxu1 %v1656_v34  ;;  %1403 = vmatprep.subr.bf16.mxu0 %v1402_v35  ;;  %v502_v34 = vld [vmem:[#allocation5 + $0xdd0] sm:$0xff]  ;;  %v1678_v35 = vpack.c.bf16 %v507_v28, %v503_v27  ;;  %v1424_v41 = vpack.c.bf16 %v504_v33, %v500_v32  ;;  %v1442_v27 = vpack.c.bf16 %v545_v22, %v541_v21  ;;  %v540_v28 = vld [vmem:[#allocation5 + $0xf00] sm:$0xff]  ;;  %v549_v33 = vld [vmem:[#allocation5 + $0xf48] sm:$0xff] }
 0x101   :  { %1659 = vmatprep.subr.bf16.mxu1 %v1658_v39  ;;  %v511_v39 = vld [vmem:[#allocation5 + $0xe18] sm:$0xff]  ;;  %v1680_v42 = vpack.c.bf16 %v506_v36, %v502_v34  ;;  %v546_v32 = vld [vmem:[#allocation5 + $0xf30] sm:$0xff]  ;;  %v553_v34 = vld [vmem:[#allocation5 + $0xf68] sm:$0xff] }
 0x102   :  { %v555_v36 = vld [vmem:[#allocation5 + $0xf78] sm:$0xff] }
 0x103   :  { %1405 = vmatpush1.bf16.msra.mxu0 %v1404_v45  ;;  %v512_v45 = vld [vmem:[#allocation5 + $0xe20] sm:$0xff] }
 0x104   :  { %1661 = vmatpush1.bf16.msra.mxu1 %v1660_v46  ;;  %1407 = vmatprep.subr.bf16.mxu0 %v1406_v47  ;;  %v510_v46 = vld [vmem:[#allocation5 + $0xe10] sm:$0xff]  ;;  %v1682_v47 = vpack.c.bf16 %v515_v40, %v511_v39  ;;  %v1428_v53 = vpack.c.bf16 %v512_v45, %v508_v44  ;;  %v1446_v39 = vpack.c.bf16 %v553_v34, %v549_v33  ;;  %v548_v40 = vld [vmem:[#allocation5 + $0xf40] sm:$0xff]  ;;  %v557_v45 = vld [vmem:[#allocation5 + $0xf88] sm:$0xff] }
 0x105   :  { %1663 = vmatprep.subr.bf16.mxu1 %v1662_v51  ;;  %v519_v51 = vld [vmem:[#allocation5 + $0xe58] sm:$0xff]  ;;  %v1684_v54 = vpack.c.bf16 %v514_v48, %v510_v46  ;;  %v554_v44 = vld [vmem:[#allocation5 + $0xf70] sm:$0xff]  ;;  %v561_v46 = vld [vmem:[#allocation5 + $0xfa8] sm:$0xff] }
 0x106   :  { %v563_v48 = vld [vmem:[#allocation5 + $0xfb8] sm:$0xff] }
 0x107   :  { %1409 = vmatpush1.bf16.msra.mxu0 %v1408_v57  ;;  %v520_v57 = vld [vmem:[#allocation5 + $0xe60] sm:$0xff] }
 0x108   :  { %1665 = vmatpush1.bf16.msra.mxu1 %v1664_v58  ;;  %1411 = vmatprep.subr.bf16.mxu0 %v1410_v59  ;;  %v518_v58 = vld [vmem:[#allocation5 + $0xe50] sm:$0xff]  ;;  %v1686_v59 = vpack.c.bf16 %v523_v52, %v519_v51  ;;  %v1432_v1 = vpack.c.bf16 %v520_v57, %v516_v56  ;;  %v1450_v51 = vpack.c.bf16 %v561_v46, %v557_v45  ;;  %v556_v52 = vld [vmem:[#allocation5 + $0xf80] sm:$0xff]  ;;  %v565_v57 = vld [vmem:[#allocation5 + $0xfc8] sm:$0xff] }
 0x109   :  { %1667 = vmatprep.subr.bf16.mxu1 %v1666_v63  ;;  %v527_v63 = vld [vmem:[#allocation5 + $0xe98] sm:$0xff]  ;;  %v1688_v2 = vpack.c.bf16 %v522_v60, %v518_v58  ;;  %v562_v56 = vld [vmem:[#allocation5 + $0xfb0] sm:$0xff]  ;;  %v569_v58 = vld [vmem:[#allocation5 + $0xfe8] sm:$0xff] }
 0x10a   :  { %v571_v60 = vld [vmem:[#allocation5 + $0xff8] sm:$0xff] }
 0x10b   :  { %1413 = vmatpush1.bf16.msra.mxu0 %v1412_v5  ;;  %v528_v5 = vld [vmem:[#allocation5 + $0xea0] sm:$0xff] }
 0x10c   :  { %1669 = vmatpush1.bf16.msra.mxu1 %v1668_v6  ;;  %1415 = vmatprep.subr.bf16.mxu0 %v1414_v7  ;;  %v526_v6 = vld [vmem:[#allocation5 + $0xe90] sm:$0xff]  ;;  %v1690_v7 = vpack.c.bf16 %v531_v0, %v527_v63  ;;  %v1436_v13 = vpack.c.bf16 %v528_v5, %v524_v4  ;;  %v1454_v63 = vpack.c.bf16 %v569_v58, %v565_v57  ;;  %v564_v0 = vld [vmem:[#allocation5 + $0xfc0] sm:$0xff] }
 0x10d   :  { %1671 = vmatprep.subr.bf16.mxu1 %v1670_v11  ;;  %v535_v11 = vld [vmem:[#allocation5 + $0xed8] sm:$0xff]  ;;  %v1692_v14 = vpack.c.bf16 %v530_v8, %v526_v6  ;;  %v570_v4 = vld [vmem:[#allocation5 + $0xff0] sm:$0xff]  ;;  %v574_v8 = vlaneseq }
 0x10f   :  { %1417 = vmatpush1.bf16.msra.mxu0 %v1416_v17  ;;  %v536_v17 = vld [vmem:[#allocation5 + $0xee0] sm:$0xff]  ;;  %v575_v9 = vshrl.u32 %v574_v8, 7 }
 0x110   :  { %1673 = vmatpush1.bf16.msra.mxu1 %v1672_v18  ;;  %1419 = vmatprep.subr.bf16.mxu0 %v1418_v19  ;;  %v534_v18 = vld [vmem:[#allocation5 + $0xed0] sm:$0xff]  ;;  %v1694_v19 = vpack.c.bf16 %v539_v12, %v535_v11  ;;  %v1440_v25 = vpack.c.bf16 %v536_v17, %v532_v16  ;;  %v572_v11 = vld [vmem:[#allocation7] sm:$0xf] }
 0x111   :  { %1675 = vmatprep.subr.bf16.mxu1 %v1674_v23  ;;  %v543_v23 = vld [vmem:[#allocation5 + $0xf18] sm:$0xff]  ;;  %v1696_v26 = vpack.c.bf16 %v538_v20, %v534_v18  ;;  %v576_v10 = vsub.s32 0, %v575_v9  ;;  %v584_v12 = vsub.s32 2, %v575_v9 }
 0x113   :  { %1421 = vmatpush1.bf16.msra.mxu0 %v1420_v29  ;;  %v544_v29 = vld [vmem:[#allocation5 + $0xf20] sm:$0xff]  ;;  %v585_v16 = vrot.slane %v572_v11, %v584_v12 }
 0x114   :  { %1677 = vmatpush1.bf16.msra.mxu1 %v1676_v30  ;;  %1423 = vmatprep.subr.bf16.mxu0 %v1422_v31  ;;  %v542_v30 = vld [vmem:[#allocation5 + $0xf10] sm:$0xff]  ;;  %v1698_v31 = vpack.c.bf16 %v547_v24, %v543_v23  ;;  %v1444_v37 = vpack.c.bf16 %v544_v29, %v540_v28 }
 0x115   :  { %1679 = vmatprep.subr.bf16.mxu1 %v1678_v35  ;;  %v551_v35 = vld [vmem:[#allocation5 + $0xf58] sm:$0xff]  ;;  %v1700_v38 = vpack.c.bf16 %v546_v32, %v542_v30 }
 0x117   :  { %1425 = vmatpush1.bf16.msra.mxu0 %v1424_v41  ;;  %v552_v41 = vld [vmem:[#allocation5 + $0xf60] sm:$0xff] }
 0x118   :  { %1681 = vmatpush1.bf16.msra.mxu1 %v1680_v42  ;;  %1427 = vmatprep.subr.bf16.mxu0 %v1426_v43  ;;  %v550_v42 = vld [vmem:[#allocation5 + $0xf50] sm:$0xff]  ;;  %v1702_v43 = vpack.c.bf16 %v555_v36, %v551_v35  ;;  %v1448_v49 = vpack.c.bf16 %v552_v41, %v548_v40 }
 0x119   :  { %1683 = vmatprep.subr.bf16.mxu1 %v1682_v47  ;;  %v559_v47 = vld [vmem:[#allocation5 + $0xf98] sm:$0xff]  ;;  %v1704_v50 = vpack.c.bf16 %v554_v44, %v550_v42 }
 0x11b   :  { %1429 = vmatpush1.bf16.msra.mxu0 %v1428_v53  ;;  %v560_v53 = vld [vmem:[#allocation5 + $0xfa0] sm:$0xff] }
 0x11c   :  { %1685 = vmatpush1.bf16.msra.mxu1 %v1684_v54  ;;  %1431 = vmatprep.subr.bf16.mxu0 %v1430_v55  ;;  %v558_v54 = vld [vmem:[#allocation5 + $0xf90] sm:$0xff]  ;;  %v1706_v55 = vpack.c.bf16 %v563_v48, %v559_v47  ;;  %v1452_v61 = vpack.c.bf16 %v560_v53, %v556_v52 }
 0x11d   :  { %1687 = vmatprep.subr.bf16.mxu1 %v1686_v59  ;;  %v567_v59 = vld [vmem:[#allocation5 + $0xfd8] sm:$0xff]  ;;  %v1708_v62 = vpack.c.bf16 %v562_v56, %v558_v54 }
 0x11f   :  { %1433 = vmatpush1.bf16.msra.mxu0 %v1432_v1  ;;  %v568_v1 = vld [vmem:[#allocation5 + $0xfe0] sm:$0xff] }
 0x120   :  { %1689 = vmatpush1.bf16.msra.mxu1 %v1688_v2  ;;  %1435 = vmatprep.subr.bf16.mxu0 %v1434_v3  ;;  %v1710_v2 = vpack.c.bf16 %v571_v60, %v567_v59  ;;  %v566_v3 = vld [vmem:[#allocation5 + $0xfd0] sm:$0xff]  ;;  %v1456_v5 = vpack.c.bf16 %v568_v1, %v564_v0 }
 0x121   :  { %1691 = vmatprep.subr.bf16.mxu1 %v1690_v7  ;;  %v1712_v6 = vpack.c.bf16 %v570_v4, %v566_v3  ;;  %v58_v7 = vld [vmem:[#allocation2 + $0x30] sm:$0xff] }
 0x123   :  { %1437 = vmatpush1.bf16.msra.mxu0 %v1436_v13  ;;  %v580_v13 = vsub.s32 1, %v575_v9 }
 0x124   :  { %1693 = vmatpush1.bf16.msra.mxu1 %v1692_v14  ;;  %1439 = vmatprep.subr.bf16.mxu0 %v1438_v15  ;;  %v588_v14 = vsub.s32 3, %v575_v9  ;;  %v577_v15 = vrot.slane %v572_v11, %v576_v10 }
 0x125   :  { %1695 = vmatprep.subr.bf16.mxu1 %v1694_v19  ;;  %v581_v17 = vrot.slane %v572_v11, %v580_v13 }
 0x126   :  { %v589_v18 = vrot.slane %v572_v11, %v588_v14 }
 0x127   :  { %1441 = vmatpush1.bf16.msra.mxu0 %v1440_v25 }
 0x128   :  { %1697 = vmatpush1.bf16.msra.mxu1 %v1696_v26  ;;  %1443 = vmatprep.subr.bf16.mxu0 %v1442_v27 }
 0x129   :  { %1699 = vmatprep.subr.bf16.mxu1 %v1698_v31 }
 0x12b   :  { %1445 = vmatpush1.bf16.msra.mxu0 %v1444_v37 }
 0x12c   :  { %1701 = vmatpush1.bf16.msra.mxu1 %v1700_v38  ;;  %1447 = vmatprep.subr.bf16.mxu0 %v1446_v39 }
 0x12d   :  { %1703 = vmatprep.subr.bf16.mxu1 %v1702_v43 }
 0x12f   :  { %1449 = vmatpush1.bf16.msra.mxu0 %v1448_v49 }
 0x130   :  { %1705 = vmatpush1.bf16.msra.mxu1 %v1704_v50  ;;  %1451 = vmatprep.subr.bf16.mxu0 %v1450_v51 }
 0x131   :  { %1707 = vmatprep.subr.bf16.mxu1 %v1706_v55 }
 0x133   :  { %1453 = vmatpush1.bf16.msra.mxu0 %v1452_v61 }
 0x134   :  { %1709 = vmatpush1.bf16.msra.mxu1 %v1708_v62  ;;  %1455 = vmatprep.subr.bf16.mxu0 %v1454_v63 }
 0x135   :  { %1711 = vmatprep.subr.bf16.mxu1 %v1710_v2 }
 0x137   :  { %1457 = vmatpush1.bf16.msra.mxu0 %v1456_v5 }
 0x138   :  { %1713 = vmatpush1.bf16.msra.mxu1 %v1712_v6 }
 0x13a   :  { %872 = vmatmul.mubr.f32.vlgmr.msra.gmra.mrb[0].mxu0 %v58_v7 }
 0x13b   :  { %1156 = vmatmul.mubr.f32.vlgmr.msra.gmra.mrb[0].mxu1 %v58_v7 }
 0x20d   :  { %v873_v19 = vpop.f32.mrb[0].mxu0 }
 0x20e   :  { %v1714_v20 = vadd.f32 %v873_v19, %v577_v15  ;;  %v1157_v21 = vpop.f32.mrb[0].mxu1  ;;  %v875_v22 = vpop.f32.mrb[1].mxu0 }
 0x20f   :  { %v1716_v23 = vadd.f32 %v1157_v21, %v585_v16  ;;  %v1715_v24 = vadd.f32 %v875_v22, %v581_v17  ;;  %v1159_v25 = vpop.f32.mrb[1].mxu1 }
 0x210   :  { %v1166_v26 = vmul.f32 0.70710677, %v1714_v20  ;;  %v1717_v27 = vadd.f32 %v1159_v25, %v589_v18  ;;  %v1162_v33 = vmul.f32 0.5, %v1714_v20 }
 0x211   :  { %v1168_v28 = vmul.f32 0.70710677, %v1716_v23  ;;  %v1167_v29 = vmul.f32 0.70710677, %v1715_v24  ;;  %v1164_v36 = vmul.f32 0.5, %v1716_v23  ;;  %v1163_v40 = vmul.f32 0.5, %v1715_v24 }
 0x212   :  { %1736 = verf.f32 %v1166_v26  ;;  %v1169_v30 = vmul.f32 0.70710677, %v1717_v27  ;;  %v1165_v43 = vmul.f32 0.5, %v1717_v27 }
 0x213   :  { %1738 = verf.f32 %v1168_v28 }
 0x214   :  { %1740 = verf.f32 %v1167_v29 }
 0x215   :  { %1742 = verf.f32 %v1169_v30 }
 0x21c   :  { %v1737_v31 = vpop.eup %1736 }
 0x21d   :  { %v1739_v32 = vpop.eup %1738  ;;  %v1174_v34 = vadd.f32 1.0, %v1737_v31 }
 0x21e   :  { %v1741_v35 = vpop.eup %1740  ;;  %v1176_v37 = vadd.f32 1.0, %v1739_v32 }
 0x21f   :  { %v1743_v38 = vpop.eup %1742  ;;  %v1178_v39 = vmul.f32 %v1174_v34, %v1162_v33  ;;  %v1175_v41 = vadd.f32 1.0, %v1741_v35 }
 0x220   :  { %v1180_v42 = vmul.f32 %v1176_v37, %v1164_v36  ;;  %v1177_v44 = vadd.f32 1.0, %v1743_v38 }
 0x221   :  { %1182 = vst [vmem:[#allocation8] sm:$0xff] %v1178_v39  ;;  %v1179_v45 = vmul.f32 %v1175_v41, %v1163_v40 }
 0x222   :  { %1184 = vst [vmem:[#allocation8 + $0x10] sm:$0xff] %v1180_v42  ;;  %v1181_v46 = vmul.f32 %v1177_v44, %v1165_v43 }
 0x223   :  { %1183 = vst [vmem:[#allocation8 + $0x8] sm:$0xff] %v1179_v45 }
 0x224   :  { %1185 = vst [vmem:[#allocation8 + $0x18] sm:$0xff] %v1181_v46 }
 0x225   :  { %1821 = shalt.err (!%p1818_p0)
}
 0x226   :  { %s1822_s25 = scalar_lea.hbm %s1915_s3, 512 }
 0x227   :  { %p1823_p1 = scmp.ne.s32.totalorder %s1915_s3, %s1822_s25  ;;  %p1826_p2 = scmp.lt.u32.totalorder %s1822_s25, %s1915_s3 }
 0x229   :  { %p1828_p3 = pnand %p1826_p2, %p1823_p1 }
 0x22b   :  { %1831 = shalt.err (!%p1828_p3)
}
 0x22c   :  { %1195 = dma.vmem_to_hbm [thread:$0]  %s1193_s21, 512, %s1915_s3, [#allocation4]  }
 0x22d   :  { %1836 = dma.done.wait [#allocation4], 512  }
 0x22e   :  { %1837 = vsyncadd [#allocation4], 4294966784 }
 0x22f   :  { %1199 = vsyncpa [#allocation3], 1 }
 0x230   :  { %1200 = vsyncpa [#allocation6], 1 }
 0x231   :  { %1201 = vsyncpa [#allocation4], 1 }

</bundles_post_ra>
